<compile_context>
chip_gen: v7x
topology: tpu7x:2x2x1
jax: 0.10.0
libtpu: 0.0.40
codegen_flags: <defaults>
</compile_context>

<pallas_src>
import functools

import jax
import jax.numpy as jnp
from jax import lax
from jax.experimental import pallas as pl
from jax.experimental.pallas import tpu as pltpu


# ----------------------------------------------------------------------------
# Pallas kernel: full non-local block on one full image (all 4 quadrants batched)
# ----------------------------------------------------------------------------
def _nonlocal_kernel(x_ref, w_tpg_ref, b_tpg_ref, w_w_ref, b_w_ref, o_ref,
                     *, H1, W1, Ci):
    """x_ref:     (1, H, W, C)  one image (NHWC), f32
       w_tpg_ref: (C, 3*Ci)     packed theta|phi|g 1x1 weights, bf16
       b_tpg_ref: (1, 3*Ci)     f32
       w_w_ref:   (Ci, C)       final W 1x1 weight, bf16
       b_w_ref:   (1, C)        f32
       o_ref:     (1, H, W, C)
    """
    _, H, W, C = x_ref.shape
    L = H1 * W1                      # tokens per quadrant
    Q = 4                            # quadrants per image
    M = Q * L                        # matmul rows per grid step

    # ---- quadrant split (major-dim reshape + sublane-aligned W slice) ----
    x = x_ref[...].reshape(2, H1, W, C)                       # [top, bottom]
    xq = jnp.concatenate([x[:, :, :W1, :], x[:, :, W1:, :]],
                         axis=0)                               # (4,H1,W1,C): TL,BL,TR,BR
    X2 = xq.reshape(M, C).astype(jnp.float32)                  # (256, 64) residual kept f32

    # ---- packed theta|phi|g projection: bf16 operands, f32 accumulation ----
    tpg = jnp.dot(X2.astype(jnp.bfloat16), w_tpg_ref[...],
                  preferred_element_type=jnp.float32) + b_tpg_ref[...]   # (M, 3Ci)
    theta = tpg[:, 0:Ci].reshape(Q, L, Ci)
    phi = tpg[:, Ci:2 * Ci].reshape(Q, L, Ci)
    g = tpg[:, 2 * Ci:3 * Ci].reshape(Q, L, Ci)

    # ---- scores + softmax (quadrant-batched); elementwise math in f32 ----
    f = lax.dot_general(theta.astype(jnp.bfloat16), phi.astype(jnp.bfloat16),
                        (((2,), (2,)), ((0,), (0,))),
                        preferred_element_type=jnp.float32)    # (Q, L, L)
    f = f - jnp.max(f, axis=-1, keepdims=True)
    p = jnp.exp(f)
    attn = p * pl.reciprocal(jnp.sum(p, axis=-1, keepdims=True), approx=True)

    # ---- attn @ g, then final W projection + residual ----
    y = lax.dot_general(attn.astype(jnp.bfloat16), g.astype(jnp.bfloat16),
                        (((2,), (1,)), ((0,), (0,))),
                        preferred_element_type=jnp.float32)    # (Q, L, Ci)
    out = jnp.dot(y.reshape(M, Ci).astype(jnp.bfloat16), w_w_ref[...],
                  preferred_element_type=jnp.float32) + b_w_ref[...] + X2

    # ---- re-assemble quadrants and store one lane-dense slab ----
    out = out.reshape(Q, H1, W1, C)
    full = jnp.concatenate([out[0:2], out[2:4]], axis=2)       # (2, H1, W, C)
    o_ref[...] = full.reshape(1, H, W, C).astype(o_ref.dtype)


# ----------------------------------------------------------------------------
# Wrappers
# ----------------------------------------------------------------------------
def nonlocal_ca_forward_nhwc(x, params):
    """Optimized entry point: x is (N, H, W, C) NHWC. Returns NHWC."""
    N, H, W, C = x.shape
    assert H % 2 == 0 and W % 2 == 0
    H1, W1 = H // 2, W // 2
    Ci = params["w_theta"].shape[1]

    # pack projection weights once (tiny, wrapper side); ship matmul weights as bf16
    w_tpg = jnp.concatenate(
        [params["w_theta"], params["w_phi"], params["w_g"]], axis=1
    ).astype(jnp.bfloat16)                                               # (C, 3Ci)
    b_tpg = jnp.concatenate(
        [params["b_theta"], params["b_phi"], params["b_g"]]
    ).reshape(1, 3 * Ci).astype(jnp.float32)
    w_w = params["w_w"].astype(jnp.bfloat16)                             # (Ci, C)
    b_w = params["b_w"].reshape(1, C).astype(jnp.float32)

    kern = functools.partial(_nonlocal_kernel, H1=H1, W1=W1, Ci=Ci)
    return pl.pallas_call(
        kern,
        out_shape=jax.ShapeDtypeStruct((N, H, W, C), x.dtype),
        grid=(N,),
        in_specs=[
            pl.BlockSpec((1, H, W, C), lambda n: (n, 0, 0, 0)),
            pl.BlockSpec((C, 3 * Ci), lambda n: (0, 0)),    # resident weights
            pl.BlockSpec((1, 3 * Ci), lambda n: (0, 0)),
            pl.BlockSpec((Ci, C), lambda n: (0, 0)),
            pl.BlockSpec((1, C), lambda n: (0, 0)),
        ],
        out_specs=pl.BlockSpec((1, H, W, C), lambda n: (n, 0, 0, 0)),
        compiler_params=pltpu.CompilerParams(
            dimension_semantics=("parallel",)),
    )(x, w_tpg, b_tpg, w_w, b_w)


def nonlocal_ca_forward(x_nchw, params):
    """PyTorch-interface wrapper: x is (N, C, H, W) NCHW.

    NOTE: each transpose is a full HBM round trip; for real integration keep the
    surrounding model NHWC and call nonlocal_ca_forward_nhwc directly.
    """
    x = jnp.transpose(x_nchw, (0, 2, 3, 1))
    out = nonlocal_ca_forward_nhwc(x, params)
    return jnp.transpose(out, (0, 3, 1, 2))


# ----------------------------------------------------------------------------
# Parameter init (deterministic, synthetic)
# ----------------------------------------------------------------------------
def init_params(key, C, Ci):
    ks = jax.random.split(key, 8)
    s = 0.05
    return dict(
        w_theta=jax.random.normal(ks[0], (C, Ci), jnp.float32) * s,
        b_theta=jax.random.normal(ks[1], (Ci,), jnp.float32) * 0.01,
        w_phi=jax.random.normal(ks[2], (C, Ci), jnp.float32) * s,
        b_phi=jax.random.normal(ks[3], (Ci,), jnp.float32) * 0.01,
        w_g=jax.random.normal(ks[4], (C, Ci), jnp.float32) * s,
        b_g=jax.random.normal(ks[5], (Ci,), jnp.float32) * 0.01,
        w_w=jax.random.normal(ks[6], (Ci, C), jnp.float32) * s,
        b_w=jax.random.normal(ks[7], (C,), jnp.float32) * 0.01,
    )


# ----------------------------------------------------------------------------
# Pure-JAX reference (correctness check only)
# ----------------------------------------------------------------------------
_P = lax.Precision.HIGHEST


def _nonlocal_ref(z, p):  # z: (N, h, w, C) NHWC
    N, h, w, C = z.shape
    X = z.reshape(N, h * w, C)
    theta = jnp.einsum("nlc,cd->nld", X, p["w_theta"], precision=_P) + p["b_theta"]
    phi = jnp.einsum("nlc,cd->nld", X, p["w_phi"], precision=_P) + p["b_phi"]
    g = jnp.einsum("nlc,cd->nld", X, p["w_g"], precision=_P) + p["b_g"]
    f = jnp.einsum("nld,nmd->nlm", theta, phi, precision=_P)
    attn = jax.nn.softmax(f, axis=-1)
    y = jnp.einsum("nlm,nmd->nld", attn, g, precision=_P)
    out = jnp.einsum("nld,dc->nlc", y, p["w_w"], precision=_P) + p["b_w"] + X
    return out.reshape(N, h, w, C)


def ref_forward(x_nchw, params):
    x = jnp.transpose(x_nchw, (0, 2, 3, 1))
    N, H, W, C = x.shape
    H1, W1 = H // 2, W // 2
    out = jnp.zeros_like(x)
    for qh in range(2):
        for qw in range(2):
            sub = x[:, qh * H1:(qh + 1) * H1, qw * W1:(qw + 1) * W1, :]
            out = out.at[:, qh * H1:(qh + 1) * H1,
                         qw * W1:(qw + 1) * W1, :].set(_nonlocal_ref(sub, params))
    return jnp.transpose(out, (0, 3, 1, 2))


# ----------------------------------------------------------------------------
if __name__ == "__main__":
    # Nonlocal_CA defaults: in_feat=64, inter_feat=32
    N, C, H, W = 2, 64, 16, 16
    Ci = 32
    key = jax.random.PRNGKey(0)
    kx, kp = jax.random.split(key)
    x = jax.random.normal(kx, (N, C, H, W), jnp.float32)   # NCHW like PyTorch
    params = init_params(kp, C, Ci)

    fwd = jax.jit(nonlocal_ca_forward)
    out = jax.block_until_ready(fwd(x, params))
    ref = jax.block_until_ready(ref_forward(x, params))

    assert out.shape == (N, C, H, W)
    max_err = float(jnp.max(jnp.abs(out - ref)))
    # bf16 MXU operands + approx reciprocal vs. HIGHEST-precision f32 reference
    assert jnp.allclose(out, ref, atol=3e-2, rtol=3e-2), f"max_err={max_err}"
    print("KERNEL_OK")
</pallas_src>

<mosaic_0001>
module attributes {stable_mosaic.version = 11 : i64} {
  func.func @_nonlocal_kernel(%arg0: i32, %arg1: memref<1x16x16x64xf32, #tpu.memory_space<vmem>>, %arg2: memref<64x96xbf16, #tpu.memory_space<vmem>>, %arg3: memref<1x96xf32, #tpu.memory_space<vmem>>, %arg4: memref<32x64xbf16, #tpu.memory_space<vmem>>, %arg5: memref<1x64xf32, #tpu.memory_space<vmem>>, %arg6: memref<1x16x16x64xf32, #tpu.memory_space<vmem>>) attributes {dimension_semantics = [#tpu.dimension_semantics<parallel>], iteration_bounds = array<i64: 2>, scalar_prefetch = 0 : i64, scratch_operands = 0 : i64, tpu.core_type = #tpu.core_type<tc>, window_params = [{transform_indices = @transform_0, window_bounds = array<i64: 1, 16, 16, 64>}, {pipeline_mode = #tpu.pipeline_mode<synchronous>, transform_indices = @transform_1, window_bounds = array<i64: 64, 96>}, {pipeline_mode = #tpu.pipeline_mode<synchronous>, transform_indices = @transform_2, window_bounds = array<i64: 1, 96>}, {pipeline_mode = #tpu.pipeline_mode<synchronous>, transform_indices = @transform_3, window_bounds = array<i64: 32, 64>}, {pipeline_mode = #tpu.pipeline_mode<synchronous>, transform_indices = @transform_4, window_bounds = array<i64: 1, 64>}, {transform_indices = @transform_5, window_bounds = array<i64: 1, 16, 16, 64>}]} {
    %c0 = arith.constant 0 : index
    %c0_0 = arith.constant 0 : index
    %c0_1 = arith.constant 0 : index
    %c0_2 = arith.constant 0 : index
    %0 = vector.load %arg1[%c0, %c0_0, %c0_1, %c0_2] : memref<1x16x16x64xf32, #tpu.memory_space<vmem>>, vector<1x16x16x64xf32>
    %1 = vector.shape_cast %0 : vector<1x16x16x64xf32> to vector<2x8x16x64xf32>
    %2 = vector.extract_strided_slice %1 {offsets = [0, 0, 0, 0], sizes = [2, 8, 8, 64], strides = [1, 1, 1, 1]} : vector<2x8x16x64xf32> to vector<2x8x8x64xf32>
    %3 = vector.extract_strided_slice %1 {offsets = [0, 0, 8, 0], sizes = [2, 8, 8, 64], strides = [1, 1, 1, 1]} : vector<2x8x16x64xf32> to vector<2x8x8x64xf32>
    %4 = tpu.concatenate %2, %3 in 0 : vector<2x8x8x64xf32>, vector<2x8x8x64xf32> -> vector<4x8x8x64xf32>
    %5 = vector.shape_cast %4 : vector<4x8x8x64xf32> to vector<256x64xf32>
    %6 = arith.truncf %5 : vector<256x64xf32> to vector<256x64xbf16>
    %c0_3 = arith.constant 0 : index
    %c0_4 = arith.constant 0 : index
    %7 = vector.load %arg2[%c0_3, %c0_4] : memref<64x96xbf16, #tpu.memory_space<vmem>>, vector<64x96xbf16>
    %cst = arith.constant dense<0.000000e+00> : vector<256x96xf32>
    %8 = tpu.matmul %6, %7, %cst {dimension_numbers = #tpu.dot_dimension_numbers<[1], [0], [0], [1], [0, 0, 1, 1], [], []>} : vector<256x64xbf16>, vector<64x96xbf16>, vector<256x96xf32> -> vector<256x96xf32>
    %c0_5 = arith.constant 0 : index
    %c0_6 = arith.constant 0 : index
    %9 = vector.load %arg3[%c0_5, %c0_6] : memref<1x96xf32, #tpu.memory_space<vmem>>, vector<1x96xf32>
    %10 = vector.broadcast %9 : vector<1x96xf32> to vector<256x96xf32>
    %11 = arith.addf %8, %10 : vector<256x96xf32>
    %12 = vector.extract_strided_slice %11 {offsets = [0, 0], sizes = [256, 32], strides = [1, 1]} : vector<256x96xf32> to vector<256x32xf32>
    %13 = vector.shape_cast %12 : vector<256x32xf32> to vector<4x64x32xf32>
    %14 = vector.extract_strided_slice %11 {offsets = [0, 32], sizes = [256, 32], strides = [1, 1]} : vector<256x96xf32> to vector<256x32xf32>
    %15 = vector.shape_cast %14 : vector<256x32xf32> to vector<4x64x32xf32>
    %16 = vector.extract_strided_slice %11 {offsets = [0, 64], sizes = [256, 32], strides = [1, 1]} : vector<256x96xf32> to vector<256x32xf32>
    %17 = vector.shape_cast %16 : vector<256x32xf32> to vector<4x64x32xf32>
    %18 = arith.truncf %13 : vector<4x64x32xf32> to vector<4x64x32xbf16>
    %19 = arith.truncf %15 : vector<4x64x32xf32> to vector<4x64x32xbf16>
    %cst_7 = arith.constant dense<0.000000e+00> : vector<4x64x64xf32>
    %20 = tpu.matmul %18, %19, %cst_7 {dimension_numbers = #tpu.dot_dimension_numbers<[2], [2], [1], [1], [0, 0, 0, 1, 1, 1], [0], [0]>} : vector<4x64x32xbf16>, vector<4x64x32xbf16>, vector<4x64x64xf32> -> vector<4x64x64xf32>
    %cst_8 = arith.constant dense<0xFF800000> : vector<4x64xf32>
    %21 = vector.multi_reduction <maximumf>, %20, %cst_8 [2] : vector<4x64x64xf32> to vector<4x64xf32>
    %22 = vector.shape_cast %21 : vector<4x64xf32> to vector<4x64x1xf32>
    %23 = vector.broadcast %22 : vector<4x64x1xf32> to vector<4x64x64xf32>
    %24 = arith.subf %20, %23 : vector<4x64x64xf32>
    %25 = math.exp %24 : vector<4x64x64xf32>
    %cst_9 = arith.constant dense<0.000000e+00> : vector<4x64xf32>
    %26 = vector.multi_reduction <add>, %25, %cst_9 [2] : vector<4x64x64xf32> to vector<4x64xf32>
    %27 = vector.shape_cast %26 : vector<4x64xf32> to vector<4x64x1xf32>
    %28 = tpu.reciprocal %27 {approx = true} : vector<4x64x1xf32> -> vector<4x64x1xf32>
    %29 = vector.broadcast %28 : vector<4x64x1xf32> to vector<4x64x64xf32>
    %30 = arith.mulf %25, %29 : vector<4x64x64xf32>
    %31 = arith.truncf %30 : vector<4x64x64xf32> to vector<4x64x64xbf16>
    %32 = arith.truncf %17 : vector<4x64x32xf32> to vector<4x64x32xbf16>
    %cst_10 = arith.constant dense<0.000000e+00> : vector<4x64x32xf32>
    %33 = tpu.matmul %31, %32, %cst_10 {dimension_numbers = #tpu.dot_dimension_numbers<[2], [1], [1], [2], [0, 0, 0, 1, 1, 2], [0], [0]>} : vector<4x64x64xbf16>, vector<4x64x32xbf16>, vector<4x64x32xf32> -> vector<4x64x32xf32>
    %34 = vector.shape_cast %33 : vector<4x64x32xf32> to vector<256x32xf32>
    %35 = arith.truncf %34 : vector<256x32xf32> to vector<256x32xbf16>
    %c0_11 = arith.constant 0 : index
    %c0_12 = arith.constant 0 : index
    %36 = vector.load %arg4[%c0_11, %c0_12] : memref<32x64xbf16, #tpu.memory_space<vmem>>, vector<32x64xbf16>
    %cst_13 = arith.constant dense<0.000000e+00> : vector<256x64xf32>
    %37 = tpu.matmul %35, %36, %cst_13 {dimension_numbers = #tpu.dot_dimension_numbers<[1], [0], [0], [1], [0, 0, 1, 1], [], []>} : vector<256x32xbf16>, vector<32x64xbf16>, vector<256x64xf32> -> vector<256x64xf32>
    %c0_14 = arith.constant 0 : index
    %c0_15 = arith.constant 0 : index
    %38 = vector.load %arg5[%c0_14, %c0_15] : memref<1x64xf32, #tpu.memory_space<vmem>>, vector<1x64xf32>
    %39 = vector.broadcast %38 : vector<1x64xf32> to vector<256x64xf32>
    %40 = arith.addf %37, %39 : vector<256x64xf32>
    %41 = arith.addf %40, %5 : vector<256x64xf32>
    %42 = vector.shape_cast %41 : vector<256x64xf32> to vector<4x8x8x64xf32>
    %43 = vector.extract_strided_slice %42 {offsets = [0, 0, 0, 0], sizes = [2, 8, 8, 64], strides = [1, 1, 1, 1]} : vector<4x8x8x64xf32> to vector<2x8x8x64xf32>
    %44 = vector.extract_strided_slice %42 {offsets = [2, 0, 0, 0], sizes = [2, 8, 8, 64], strides = [1, 1, 1, 1]} : vector<4x8x8x64xf32> to vector<2x8x8x64xf32>
    %45 = tpu.concatenate %43, %44 in 2 : vector<2x8x8x64xf32>, vector<2x8x8x64xf32> -> vector<2x8x16x64xf32>
    %46 = vector.shape_cast %45 : vector<2x8x16x64xf32> to vector<1x16x16x64xf32>
    %c0_16 = arith.constant 0 : index
    %c0_17 = arith.constant 0 : index
    %c0_18 = arith.constant 0 : index
    %c0_19 = arith.constant 0 : index
    %47 = vector.load %arg6[%c0_16, %c0_17, %c0_18, %c0_19] : memref<1x16x16x64xf32, #tpu.memory_space<vmem>>, vector<1x16x16x64xf32>
    tpu.vector_store %arg6[%c0_16, %c0_17, %c0_18, %c0_19], %46 {strides = array<i32>} : memref<1x16x16x64xf32, #tpu.memory_space<vmem>>, vector<1x16x16x64xf32>,
    return
  }
  func.func @transform_0(%arg0: i32) -> (i32, i32, i32, i32) {
    %c0_i32 = arith.constant 0 : i32
    %c0_i32_0 = arith.constant 0 : i32
    %c0_i32_1 = arith.constant 0 : i32
    %c0_i32_2 = arith.constant 0 : i32
    return %arg0, %c0_i32, %c0_i32_0, %c0_i32_1 : i32, i32, i32, i32
  }
  func.func @transform_1(%arg0: i32) -> (i32, i32) {
    %c0_i32 = arith.constant 0 : i32
    %c0_i32_0 = arith.constant 0 : i32
    %c0_i32_1 = arith.constant 0 : i32
    return %c0_i32, %c0_i32_0 : i32, i32
  }
  func.func @transform_2(%arg0: i32) -> (i32, i32) {
    %c0_i32 = arith.constant 0 : i32
    %c0_i32_0 = arith.constant 0 : i32
    %c0_i32_1 = arith.constant 0 : i32
    return %c0_i32, %c0_i32_0 : i32, i32
  }
  func.func @transform_3(%arg0: i32) -> (i32, i32) {
    %c0_i32 = arith.constant 0 : i32
    %c0_i32_0 = arith.constant 0 : i32
    %c0_i32_1 = arith.constant 0 : i32
    return %c0_i32, %c0_i32_0 : i32, i32
  }
  func.func @transform_4(%arg0: i32) -> (i32, i32) {
    %c0_i32 = arith.constant 0 : i32
    %c0_i32_0 = arith.constant 0 : i32
    %c0_i32_1 = arith.constant 0 : i32
    return %c0_i32, %c0_i32_0 : i32, i32
  }
  func.func @transform_5(%arg0: i32) -> (i32, i32, i32, i32) {
    %c0_i32 = arith.constant 0 : i32
    %c0_i32_0 = arith.constant 0 : i32
    %c0_i32_1 = arith.constant 0 : i32
    %c0_i32_2 = arith.constant 0 : i32
    return %arg0, %c0_i32, %c0_i32_0, %c0_i32_1 : i32, i32, i32, i32
  }
}

</mosaic_0001>

<bundles_post_ra>
// kernel: nonlocal_ca_forward.1
= control target key start
LH: loop header
LB: loop body
LE: loop exit
PB: predicated region body
PF: predicated region fallthrough
CT: control target
= control target key end

     0   :  { %10 = vsyncpa [#allocation3], 0  ;;  %s3797_s0 = inlined_call_operand.hbm [shape: f32[2,16,16,64], index: 0, kind: input, shape index: {}]   ;;  %s3798_s1 = inlined_call_operand.vmem [shape: bf16[64,96], index: 1, kind: input, shape index: {}]   ;;  %s3799_s2 = inlined_call_operand.vmem [shape: f32[1,96], index: 2, kind: input, shape index: {}]   ;;  %s3800_s3 = inlined_call_operand.vmem [shape: bf16[32,64], index: 3, kind: input, shape index: {}]   ;;  %s3801_s4 = inlined_call_operand.vmem [shape: f32[1,64], index: 4, kind: input, shape index: {}]   ;;  %s3802_s5 = inlined_call_operand.hbm [shape: f32[2,16,16,64], index: 5, kind: output, shape index: {}]  }
   0x1   :  { %12 = vsyncpa [#allocation3 + $0x1], 0 }
   0x2   :  { %13 = vsyncpa [#allocation4], 0 }
   0x3   :  { %15 = vsyncpa [#allocation4 + $0x1], 0  ;;  %s2853_s18 = smov 0   ;;  %s2855_s19 = smov 0  }
   0x4   :  { %s2857_s20 = smov 0   ;;  %s2859_s21 = smov 0  }
   0x5 LB: > { %s2874_s22 = sadd.s32 4294967295, %s2813_s21   ;;  %s2085_s23 = sadd.s32 4294967294, %s2813_s21   ;;  %s2813_s21 = sphi %s2859_s21, %s3815_s21   ;;  %s2809_s20 = sphi %s2857_s20, %s3814_s20   ;;  %s2805_s19 = sphi %s2855_s19, %s3813_s19   ;;  %s2801_s18 = sphi %s2853_s18, %s3812_s18  }
   0x6   : > { %s2878_s24 = sadd.s32 1, %s2813_s21   ;;  %s28_s25 = sadd.s32 1, %s2809_s20 }
   0x7   : > { %s25_s26 = ssub.s32 %s2813_s21, %s2878_s24  ;;  %p35_p0 = scmp.ne.s32.totalorder %s2809_s20, %s2805_s19 }
   0x8   : > { %p26_p1 = scmp.eq.s32.totalorder %s25_s26, 0  ;;  %p36_p2 = scmp.eq.s32.totalorder %s2813_s21, 0 }
   0x9   : > { %p41_p3 = scmp.ne.s32.totalorder %s2805_s19, %s2801_s18  ;;  %p42_p4 = scmp.eq.s32.totalorder %s2874_s22, 0 }
   0xa   : > { %s2890_s27 = scalar_select %p26_p1, %s2809_s20, %s28_s25  }
   0xb   : > { %p2892_p5 = por %p36_p2, %p35_p0  ;;  %p2896_p6 = por %p42_p4, %p41_p3 }
   0xc   : > { %p149_p7 = scmp.eq.s32.totalorder %s2874_s22, 1  ;;  %p155_p8 = scmp.eq.s32.totalorder %s2085_s23, 1 }
   0xd   : > { %p2511_p10 = scmp.lt.s32.totalorder %s2813_s21, 2  ;;  %s187_s7 = sand.u32 1, %s2809_s20  }
   0xe   : > { %p2903_p11 = por %p149_p7, %p35_p0  ;;  %p2907_p12 = por %p155_p8, %p41_p3 }
   0xf   : > { %s2171_s8 = sshll.u32 %s2813_s21, 12  ;;  %s2088_s9 = sshll.u32 %s187_s7, 8 }
  0x10   : > { %s3806_s30 = scalar_select %p2903_p11, 1, 0 }
  0x11   : > { %s3807_s6 = scalar_select %p2907_p12, 1, 0 }
  0x12   : > { %s2916_s12 = scalar_lea.hbm %s3797_s0, %s2171_s8  ;;  %s191_s13 = scalar_lea.vmem [#allocation2], %s2088_s9 }
  0x13   : > { %s198_s14 = sshll.u32 %s191_s13, 4  ;;  %p2920_p13 = pnand %p2511_p10, %p2892_p5  ;;  %s2924_s14 = int_to_ptr.vmem [resolvable:$true] %s198_s14 }
  0x14   : > { %s2926_s16 = scalar_lea.sflag [#allocation3], %s187_s7  ;;  %s2717_s17 = scalar_lea.hbm %s2916_s12, 4096 }
  0x15   : > { %p2718_p0 = scmp.ne.s32.totalorder %s2916_s12, %s2717_s17  ;;  %p2719_p1 = pneg %p2920_p13 }
  0x16   : > { %s2722_s26 = scalar_lea.hbm %s3797_s0, 8192  ;;  %p2723_p4 = scmp.lt.u32.totalorder %s2916_s12, %s3797_s0 }
  0x17   : > { %p2720_p2 = pnand %p2719_p1, %p2718_p0  ;;  %p2724_p5 = scmp.lt.u32.totalorder %s2722_s26, %s2717_s17 }
  0x18   : > { %p2726_p8 = scmp.lt.u32.totalorder %s2717_s17, %s2916_s12 }
  0x19   : > { %p2721_p3 = pneg %p2720_p2  ;;  %p2725_p7 = por %p2724_p5, %p2723_p4 }
  0x1b   : > { %p2727_p10 = por %p2726_p8, %p2725_p7 }
  0x1d   : > { %p2728_p9 = pnand %p2727_p10, %p2721_p3 }
  0x1f   : > { %2731 = shalt.err (!%p2728_p9)
}
  0x20   : > { %s2732_s7 = scalar_lea.vmem %s2924_s14, 4096  ;;  %s2815_s9 = smov [#allocation2]  }
  0x21   : > { %p2733_p0 = scmp.ne.s32.totalorder %s2924_s14, %s2732_s7  ;;  %s2737_s10 = sshll.u32 %s2815_s9, 4  ;;  %s2738_s10 = int_to_ptr.vmem [resolvable:$false] %s2737_s10 }
  0x22   : > { %s2739_s11 = scalar_lea.vmem %s2738_s10, 8192  ;;  %p2740_p11 = scmp.lt.s32.totalorder %s2924_s14, %s2738_s10 }
  0x23   : > { %p2735_p2 = pnand %p2733_p0, %p2719_p1  ;;  %p2741_p4 = scmp.lt.s32.totalorder %s2739_s11, %s2732_s7 }
  0x25   : > { %p2736_p12 = pneg %p2735_p2  ;;  %p2742_p5 = por %p2741_p4, %p2740_p11 }
  0x27   : > { %p2743_p7 = pnand %p2742_p5, %p2736_p12 }
  0x29   : > { %2746 = shalt.err (!%p2743_p7)
}
  0x2a   : > { %s2816_s13 = smov 128   ;;  %s2817_s17 = smov 8  }
  0x2b   : > { %2506 = dma.hbm_to_vmem [thread:$0]  (!%p2920_p13), %s2916_s12, 4096, %s2924_s14, %s2926_s16, %s2816_s13, %s2816_s13, %s2817_s17  }
  0x2c   : > { %p2091_p9 = scmp.ge.s32.totalorder %s2813_s21, 1  ;;  %p206_p1 = scmp.lt.s32.totalorder %s2813_s21, 3 }
  0x2e   : > { %p207_p3 = pnand %p2091_p9, %p206_p1 }
  0x2f   : > { %s2957_s23 = sand.u32 (!%p207_p3), 1, %s2805_s19  }
  0x30   : > { %210 = sbr.rel (%p207_p3) target bundleno = 1515 (0x5eb), region = 40  ;;  %s2092_s25 = sshll.u32 (!%p207_p3), %s2957_s23, 8 }
  0x31   : > { %s213_s26 = scalar_lea.sflag (!%p207_p3), [#allocation3], %s2957_s23  ;;  %s2963_s28 = scalar_lea.vmem (!%p207_p3), [#allocation2], %s2092_s25 }
  0x37   : > { %2792 = dma.done.wait (%p2896_p6), %s213_s26, 4096  }
  0x38   : > { %2794 = vsyncadd (%p2896_p6), %s213_s26, 4294963200  ;;  %v2551_v0 = vld [vmem:[%s3798_s1] sm:$0xff]   ;;  %v2552_v1 = vld [vmem:[%s3798_s1 + $0x8] sm:$0xff]   ;;  %vm331_vm0 = vcmask 523264   ;;  %vm569_vm1 = vcmask 261120   ;;  %s2818_s13 = smov 96  }
  0x39   : > { %2275 = vmatprep.subr.bf16.mxu0 %v2551_v0  ;;  %v2553_v2 = vld [vmem:[%s3798_s1 + $0x10] sm:$0xff]   ;;  %v244_v3 = vld [vmem:[%s2963_s28] sm:$0xff]  ;;  %v2554_v6 = vld [vmem:[%s3798_s1 + $0x18] sm:$0xff]   ;;  %s2819_s17 = smov 64   ;;  %s3622_s29 = scalar_lea.vmem [#allocation5], %s2092_s25 }
  0x3a   : > { %2276 = vmatpush3.bf16.msra.mxu0 %v2551_v0  ;;  %v246_v4 = vld [vmem:[%s2963_s28 + $0x10] sm:$0xff]  ;;  %v248_v7 = vld [vmem:[%s2963_s28 + $0x20] sm:$0xff]  ;;  %v245_v27 = vld [vmem:[%s2963_s28 + $0x8] sm:$0xff]  ;;  %s2172_s25 = sshll.u32 %s2874_s22, 12  ;;  %s2012_s7 = sshll.u32 %s3622_s29, 4  ;;  %s3746_s7 = int_to_ptr.vmem [resolvable:$true] %s2012_s7 }
  0x3b   : > { %2277 = vmatprep.subr.bf16.mxu0 %v2552_v1  ;;  %v276_v5 = vpack.c.bf16 %v246_v4, %v244_v3  ;;  %v250_v8 = vld [vmem:[%s2963_s28 + $0x30] sm:$0xff]  ;;  %v252_v9 = vld [vmem:[%s2963_s28 + $0x40] sm:$0xff]  ;;  %v247_v28 = vld [vmem:[%s2963_s28 + $0x18] sm:$0xff]  ;;  %s3744_s10 = scalar_lea.hbm %s3802_s5, %s2172_s25  ;;  %s1999_s11 = scalar_lea.sflag [#allocation4], %s2957_s23 }
  0x3c   : > { %v254_v10 = vld [vmem:[%s2963_s28 + $0x50] sm:$0xff]  ;;  %v277_v11 = vpack.c.bf16 %v250_v8, %v248_v7  ;;  %v256_v13 = vld [vmem:[%s2963_s28 + $0x60] sm:$0xff]  ;;  %v284_v30 = vpack.c.bf16 %v247_v28, %v245_v27  ;;  %v249_v31 = vld [vmem:[%s2963_s28 + $0x28] sm:$0xff]  ;;  %p3809_p11 = scmp.ne.s32.totalorder %s3806_s30, 0 }
  0x3d   : > { %2283 = vmatprep.mubr.msk.bf16.mxu0 %vm331_vm0, %v276_v5  ;;  %v278_v12 = vpack.c.bf16 %v254_v10, %v252_v9  ;;  %v258_v14 = vld [vmem:[%s2963_s28 + $0x70] sm:$0xff]  ;;  %v260_v15 = vld [vmem:[%s2963_s28 + $0x80] sm:$0xff]  ;;  %v251_v32 = vld [vmem:[%s2963_s28 + $0x38] sm:$0xff] }
  0x3e   : > { %2278 = vmatpush3.bf16.msra.mxu0 %v2552_v1  ;;  %v262_v16 = vld [vmem:[%s2963_s28 + $0x90] sm:$0xff]  ;;  %v279_v17 = vpack.c.bf16 %v258_v14, %v256_v13  ;;  %v264_v19 = vld [vmem:[%s2963_s28 + $0xa0] sm:$0xff]  ;;  %v253_v33 = vld [vmem:[%s2963_s28 + $0x48] sm:$0xff]  ;;  %v285_v35 = vpack.c.bf16 %v251_v32, %v249_v31 }
  0x3f   : > { %2279 = vmatprep.subr.bf16.mxu0 %v2553_v2  ;;  %v280_v18 = vpack.c.bf16 %v262_v16, %v260_v15  ;;  %v266_v20 = vld [vmem:[%s2963_s28 + $0xb0] sm:$0xff]  ;;  %v268_v21 = vld [vmem:[%s2963_s28 + $0xc0] sm:$0xff]  ;;  %v255_v34 = vld [vmem:[%s2963_s28 + $0x58] sm:$0xff] }
  0x40   : > { %v270_v22 = vld [vmem:[%s2963_s28 + $0xd0] sm:$0xff]  ;;  %v281_v23 = vpack.c.bf16 %v266_v20, %v264_v19  ;;  %v272_v25 = vld [vmem:[%s2963_s28 + $0xe0] sm:$0xff]  ;;  %v286_v36 = vpack.c.bf16 %v255_v34, %v253_v33  ;;  %v257_v37 = vld [vmem:[%s2963_s28 + $0x68] sm:$0xff] }
  0x41   : > { %v282_v24 = vpack.c.bf16 %v270_v22, %v268_v21  ;;  %v274_v26 = vld [vmem:[%s2963_s28 + $0xf0] sm:$0xff]  ;;  %v259_v38 = vld [vmem:[%s2963_s28 + $0x78] sm:$0xff]  ;;  %v261_v39 = vld [vmem:[%s2963_s28 + $0x88] sm:$0xff] }
  0x42   : > { %2280 = vmatpush3.bf16.msra.mxu0 %v2553_v2  ;;  %v283_v29 = vpack.c.bf16 %v274_v26, %v272_v25  ;;  %v263_v40 = vld [vmem:[%s2963_s28 + $0x98] sm:$0xff]  ;;  %v287_v41 = vpack.c.bf16 %v259_v38, %v257_v37  ;;  %v265_v43 = vld [vmem:[%s2963_s28 + $0xa8] sm:$0xff]  ;;  %v3032_v53 = vld [vmem:[%s3799_s2] ss:$0 sm:$0xff] }
  0x43   : > { %2281 = vmatprep.subr.bf16.mxu0 %v2554_v6  ;;  %v288_v42 = vpack.c.bf16 %v263_v40, %v261_v39  ;;  %v267_v44 = vld [vmem:[%s2963_s28 + $0xb8] sm:$0xff]  ;;  %v269_v45 = vld [vmem:[%s2963_s28 + $0xc8] sm:$0xff] }
  0x44   : > { %v271_v46 = vld [vmem:[%s2963_s28 + $0xd8] sm:$0xff]  ;;  %v289_v47 = vpack.c.bf16 %v267_v44, %v265_v43  ;;  %v273_v49 = vld [vmem:[%s2963_s28 + $0xe8] sm:$0xff] }
  0x45   : > { %v290_v48 = vpack.c.bf16 %v271_v46, %v269_v45  ;;  %v275_v50 = vld [vmem:[%s2963_s28 + $0xf8] sm:$0xff] }
  0x46   : > { %2282 = vmatpush3.bf16.msra.mxu0 %v2554_v6  ;;  %v291_v51 = vpack.c.bf16 %v275_v50, %v273_v49 }
  0x49   : > { %2284 = vmatmul.mubr.msk.bf16.vlgmr.msra.gmra.mrb[0].mxu0 %vm331_vm0, %v277_v11 }
  0x4a   : > { %2287 = vmatprep.mubr.msk.bf16.mxu0 %vm331_vm0, %v278_v12 }
  0x51   : > { %2288 = vmatmul.mubr.msk.bf16.gmra.mrb[4].mxu0 %vm331_vm0, %v279_v17 }
  0x52   : > { %2291 = vmatprep.mubr.msk.bf16.mxu0 %vm331_vm0, %v280_v18 }
  0x59   : > { %2292 = vmatmul.mubr.msk.bf16.gmra.mrb[8].mxu0 %vm331_vm0, %v281_v23 }
  0x5a   : > { %2295 = vmatprep.mubr.msk.bf16.mxu0 %vm331_vm0, %v282_v24 }
  0x61   : > { %2296 = vmatmul.mubr.msk.bf16.gmra.mrb[12].mxu0 %vm331_vm0, %v283_v29 }
  0x62   : > { %2299 = vmatprep.mubr.msk.bf16.mxu0 %vm331_vm0, %v284_v30 }
  0x69   : > { %2300 = vmatmul.mubr.msk.bf16.gmra.mrb[16].mxu0 %vm331_vm0, %v285_v35 }
  0x6a   : > { %2303 = vmatprep.mubr.msk.bf16.mxu0 %vm331_vm0, %v286_v36 }
  0x71   : > { %2304 = vmatmul.mubr.msk.bf16.gmra.mrb[20].mxu0 %vm331_vm0, %v287_v41 }
  0x72   : > { %2307 = vmatprep.mubr.msk.bf16.mxu0 %vm331_vm0, %v288_v42 }
  0x79   : > { %2308 = vmatmul.mubr.msk.bf16.gmra.mrb[24].mxu0 %vm331_vm0, %v289_v47 }
  0x7a   : > { %2311 = vmatprep.mubr.msk.bf16.mxu0 %vm331_vm0, %v290_v48 }
  0x81   : > { %2312 = vmatmul.mubr.msk.bf16.gmra.mrb[28].mxu0 %vm331_vm0, %v291_v51 }
 0x11c   : > { %v2285_v52 = vpop.f32.mrb[0].mxu0 }
 0x11d   : > { %v414_v54 = vpop.f32.mrb[1].mxu0  ;;  %v423_v56 = vadd.f32 %v2285_v52, %v3032_v53 }
 0x11e   : > { %v2286_v55 = vpop.f32.mrb[2].mxu0  ;;  %v415_v59 = vadd.f32 %v3032_v53, %v414_v54 }
 0x11f   : > { %v426_v57 = vadd.f32 %v2286_v55, %v3032_v53  ;;  %v417_v58 = vpop.f32.mrb[3].mxu0 }
 0x120   : > { %v418_v60 = vadd.f32 %v3032_v53, %v417_v58 }
 0x121   : > { %v3038_v61 = vpack.c.bf16 %v426_v57, %v423_v56 }
 0x122   : > { %v3040_v62 = vpack.c.bf16 %v418_v60, %v415_v59 }
 0x124   : > { %v2289_v63 = vpop.f32.mrb[4].mxu0  ;;  %561 = vrot.lane.b32.xlu0 %v3040_v62, %s2818_s13  ;;  %2323 = vmatprep.mubr.msk.bf16.mxu1 %vm569_vm1, %v3040_v62 }
 0x125   : > { %v439_v0 = vadd.f32 %v2289_v63, %v3032_v53  ;;  %v430_v1 = vpop.f32.mrb[5].mxu0 }
 0x126   : > { %v431_v2 = vadd.f32 %v3032_v53, %v430_v1  ;;  %v2290_v3 = vpop.f32.mrb[6].mxu0 }
 0x127   : > { %v442_v4 = vadd.f32 %v2290_v3, %v3032_v53  ;;  %v433_v5 = vpop.f32.mrb[7].mxu0 }
 0x128   : > { %v434_v6 = vadd.f32 %v3032_v53, %v433_v5  ;;  %563 = vrot.lane.b32.xlu0 %v3038_v61, %s2818_s13 }
 0x129   : > { %v3052_v7 = vpack.c.bf16 %v442_v4, %v439_v0 }
 0x12a   : > { %v3054_v8 = vpack.c.bf16 %v434_v6, %v431_v2 }
 0x12c   : > { %v2293_v9 = vpop.f32.mrb[8].mxu0  ;;  %565 = vrot.lane.b32.xlu1 %v3054_v8, %s2818_s13 }
 0x12d   : > { %v455_v10 = vadd.f32 %v2293_v9, %v3032_v53  ;;  %v446_v11 = vpop.f32.mrb[9].mxu0 }
 0x12e   : > { %v447_v12 = vadd.f32 %v3032_v53, %v446_v11  ;;  %v2294_v13 = vpop.f32.mrb[10].mxu0 }
 0x12f   : > { %v458_v14 = vadd.f32 %v2294_v13, %v3032_v53  ;;  %v449_v15 = vpop.f32.mrb[11].mxu0 }
 0x130   : > { %v450_v16 = vadd.f32 %v3032_v53, %v449_v15  ;;  %567 = vrot.lane.b32.xlu1 %v3052_v7, %s2818_s13 }
 0x131   : > { %v3064_v17 = vpack.c.bf16 %v458_v14, %v455_v10 }
 0x132   : > { %v3066_v18 = vpack.c.bf16 %v450_v16, %v447_v12 }
 0x134   : > { %v2297_v19 = vpop.f32.mrb[12].mxu0  ;;  %665 = vrot.lane.b32.xlu1 %v3064_v17, %s2818_s13  ;;  %663 = vrot.lane.b32.xlu0 %v3066_v18, %s2818_s13 }
 0x135   : > { %v471_v20 = vadd.f32 %v2297_v19, %v3032_v53  ;;  %v462_v21 = vpop.f32.mrb[13].mxu0 }
 0x136   : > { %v463_v22 = vadd.f32 %v3032_v53, %v462_v21  ;;  %v2298_v23 = vpop.f32.mrb[14].mxu0 }
 0x137   : > { %v474_v24 = vadd.f32 %v2298_v23, %v3032_v53  ;;  %v465_v25 = vpop.f32.mrb[15].mxu0 }
 0x138   : > { %v466_v26 = vadd.f32 %v3032_v53, %v465_v25 }
 0x139   : > { %v3076_v27 = vpack.c.bf16 %v474_v24, %v471_v20 }
 0x13a   : > { %v3078_v28 = vpack.c.bf16 %v466_v26, %v463_v22 }
 0x13c   : > { %v2301_v29 = vpop.f32.mrb[16].mxu0  ;;  %667 = vrot.lane.b32.xlu0 %v3078_v28, %s2818_s13 }
 0x13d   : > { %v487_v30 = vadd.f32 %v2301_v29, %v3032_v53  ;;  %v478_v31 = vpop.f32.mrb[17].mxu0 }
 0x13e   : > { %v479_v32 = vadd.f32 %v3032_v53, %v478_v31  ;;  %v2302_v33 = vpop.f32.mrb[18].mxu0 }
 0x13f   : > { %v490_v34 = vadd.f32 %v2302_v33, %v3032_v53  ;;  %v481_v35 = vpop.f32.mrb[19].mxu0 }
 0x140   : > { %v482_v36 = vadd.f32 %v3032_v53, %v481_v35  ;;  %669 = vrot.lane.b32.xlu0 %v3076_v27, %s2818_s13 }
 0x141   : > { %v3088_v37 = vpack.c.bf16 %v490_v34, %v487_v30 }
 0x142   : > { %v549_v38 = vpack.c.bf16 %v482_v36, %v479_v32 }
 0x144   : > { %2355 = vmatprep.mubr.msk.bf16.mxu0 %vm569_vm1, %v549_v38  ;;  %764 = vrot.lane.b32.xlu1 %v549_v38, %s2818_s13  ;;  %v2305_v39 = vpop.f32.mrb[20].mxu0 }
 0x145   : > { %v503_v40 = vadd.f32 %v2305_v39, %v3032_v53  ;;  %v494_v41 = vpop.f32.mrb[21].mxu0 }
 0x146   : > { %v495_v42 = vadd.f32 %v3032_v53, %v494_v41  ;;  %v2306_v43 = vpop.f32.mrb[22].mxu0 }
 0x147   : > { %v506_v44 = vadd.f32 %v2306_v43, %v3032_v53  ;;  %v497_v45 = vpop.f32.mrb[23].mxu0 }
 0x148   : > { %766 = vrot.lane.b32.xlu1 %v3088_v37, %s2818_s13  ;;  %v498_v46 = vadd.f32 %v3032_v53, %v497_v45 }
 0x149   : > { %v3098_v47 = vpack.c.bf16 %v506_v44, %v503_v40 }
 0x14a   : > { %v3100_v48 = vpack.c.bf16 %v498_v46, %v495_v42 }
 0x14c   : > { %v2309_v49 = vpop.f32.mrb[24].mxu0  ;;  %768 = vrot.lane.b32.xlu0 %v3100_v48, %s2818_s13 }
 0x14d   : > { %v519_v50 = vadd.f32 %v2309_v49, %v3032_v53  ;;  %v510_v51 = vpop.f32.mrb[25].mxu0 }
 0x14e   : > { %v511_v52 = vadd.f32 %v3032_v53, %v510_v51  ;;  %v2310_v54 = vpop.f32.mrb[26].mxu0 }
 0x14f   : > { %v522_v55 = vadd.f32 %v2310_v54, %v3032_v53  ;;  %v513_v56 = vpop.f32.mrb[27].mxu0 }
 0x150   : > { %v514_v57 = vadd.f32 %v3032_v53, %v513_v56  ;;  %770 = vrot.lane.b32.xlu0 %v3098_v47, %s2818_s13 }
 0x151   : > { %v3110_v58 = vpack.c.bf16 %v522_v55, %v519_v50 }
 0x152   : > { %v3112_v59 = vpack.c.bf16 %v514_v57, %v511_v52 }
 0x154   : > { %v2313_v60 = vpop.f32.mrb[28].mxu0  ;;  %865 = vrot.lane.b32.xlu1 %v3112_v59, %s2818_s13 }
 0x155   : > { %v535_v63 = vadd.f32 %v2313_v60, %v3032_v53  ;;  %v526_v0 = vpop.f32.mrb[29].mxu0 }
 0x156   : > { %v527_v1 = vadd.f32 %v3032_v53, %v526_v0  ;;  %v2314_v2 = vpop.f32.mrb[30].mxu0 }
 0x157   : > { %v538_v3 = vadd.f32 %v2314_v2, %v3032_v53  ;;  %v529_v4 = vpop.f32.mrb[31].mxu0 }
 0x158   : > { %v530_v5 = vadd.f32 %v3032_v53, %v529_v4  ;;  %867 = vrot.lane.b32.xlu1 %v3110_v58, %s2818_s13 }
 0x159   : > { %v3122_v6 = vpack.c.bf16 %v538_v3, %v535_v63 }
 0x15a   : > { %v3124_v9 = vpack.c.bf16 %v530_v5, %v527_v1 }
 0x15c   : > { %871 = vrot.lane.b32.xlu1 %v3122_v6, %s2818_s13  ;;  %869 = vrot.lane.b32.xlu0 %v3124_v9, %s2818_s13  ;;  %s2747_s13 = scalar_lea.vmem %s3746_s7, 4096 }
 0x15d   : > { %p2748_p6 = scmp.ne.s32.totalorder %s3746_s7, %s2747_s13 }
 0x15f   : > { %p2749_p12 = pnand %p2748_p6, %p3809_p11 }
 0x160   : > { %1330 = vrot.lane.b32.xlu1 %v3040_v62, %s2819_s17  ;;  %1334 = vrot.lane.b32.xlu0 %v3054_v8, %s2819_s17 }
 0x161   : > { %p2750_p13 = pneg %p2749_p12 }
 0x164   : > { %1332 = vrot.lane.b32.xlu1 %v3038_v61, %s2819_s17  ;;  %1419 = vrot.lane.b32.xlu0 %v3066_v18, %s2819_s17 }
 0x168   : > { %1336 = vrot.lane.b32.xlu1 %v3052_v7, %s2819_s17  ;;  %1421 = vrot.lane.b32.xlu0 %v3064_v17, %s2819_s17 }
 0x16c   : > { %1423 = vrot.lane.b32.xlu1 %v3078_v28, %s2819_s17  ;;  %1425 = vrot.lane.b32.xlu0 %v3076_v27, %s2819_s17 }
 0x170   : > { %1508 = vrot.lane.b32.xlu1 %v549_v38, %s2819_s17  ;;  %1510 = vrot.lane.b32.xlu0 %v3088_v37, %s2819_s17 }
 0x174   : > { %1512 = vrot.lane.b32.xlu1 %v3100_v48, %s2819_s17 }
 0x196   : > { %v562_v53 = vpop.permute.xlu0 %561 }
 0x197   : > { %2483 = vmatprep.subr.msk.bf16.mxu1 %vm569_vm1, %v562_v53  ;;  %v583_v62 = vsel %vm569_vm1, %v562_v53, 0 }
 0x198   : > { %2316 = vmatpush3.bf16.xpose.msra.mxu1 %v583_v62 }
 0x19a   : > { %v564_v10 = vpop.permute.xlu0 %563 }
 0x19b   : > { %2484 = vmatprep.subr.msk.bf16.mxu1 %vm569_vm1, %v564_v10  ;;  %v586_v11 = vsel %vm569_vm1, %v564_v10, 0 }
 0x19e   : > { %v566_v12 = vpop.permute.xlu1 %565 }
 0x19f   : > { %v589_v13 = vsel %vm569_vm1, %v566_v12, 0 }
 0x1a0   : > { %2318 = vmatpush3.bf16.xpose.msra.mxu1 %v586_v11 }
 0x1a1   : > { %2485 = vmatprep.subr.msk.bf16.mxu1 %vm569_vm1, %v566_v12 }
 0x1a2   : > { %v568_v14 = vpop.permute.xlu1 %567 }
 0x1a3   : > { %v592_v15 = vsel %vm569_vm1, %v568_v14, 0 }
 0x1a6   : > { %v664_v16 = vpop.permute.xlu0 %663  ;;  %v666_v19 = vpop.permute.xlu1 %665 }
 0x1a7   : > { %v684_v21 = vsel %vm569_vm1, %v664_v16, 0  ;;  %v687_v26 = vsel %vm569_vm1, %v666_v19, 0 }
 0x1a8   : > { %2320 = vmatpush3.bf16.xpose.msra.mxu1 %v589_v13 }
 0x1a9   : > { %2486 = vmatprep.subr.msk.bf16.mxu1 %vm569_vm1, %v568_v14 }
 0x1ae   : > { %v668_v22 = vpop.permute.xlu0 %667 }
 0x1af   : > { %v690_v31 = vsel %vm569_vm1, %v668_v22, 0 }
 0x1b0   : > { %2322 = vmatpush3.bf16.xpose.msra.mxu1 %v592_v15 }
 0x1b1   : > { %2487 = vmatprep.subr.msk.bf16.mxu1 %vm569_vm1, %v664_v16 }
 0x1b2   : > { %v670_v25 = vpop.permute.xlu0 %669 }
 0x1b3   : > { %v693_v33 = vsel %vm569_vm1, %v670_v25, 0 }
 0x1b6   : > { %v765_v20 = vpop.permute.xlu1 %764 }
 0x1b7   : > { %v785_v23 = vsel %vm569_vm1, %v765_v20, 0  ;;  %2324 = vmatmul.mubr.msk.bf16.vlgmr.msra.gmra.mrb[0].mxu1 %vm569_vm1, %v3038_v61  ;;  %2491 = vmatprep.subr.msk.bf16.mxu0 %vm569_vm1, %v765_v20 }
 0x1b8   : > { %2327 = vmatprep.mubr.msk.bf16.mxu1 %vm569_vm1, %v3054_v8  ;;  %2332 = vmatpush3.bf16.xpose.msra.mxu1 %v684_v21 }
 0x1b9   : > { %2348 = vmatpush3.bf16.xpose.msra.mxu0 %v785_v23  ;;  %2488 = vmatprep.subr.msk.bf16.mxu1 %vm569_vm1, %v666_v19 }
 0x1ba   : > { %v767_v24 = vpop.permute.xlu1 %766 }
 0x1bb   : > { %2492 = vmatprep.subr.msk.bf16.mxu0 %vm569_vm1, %v767_v24  ;;  %v788_v61 = vsel %vm569_vm1, %v767_v24, 0 }
 0x1be   : > { %v769_v8 = vpop.permute.xlu0 %768 }
 0x1bf   : > { %2328 = vmatmul.mubr.msk.bf16.gmra.mrb[4].mxu1 %vm569_vm1, %v3052_v7  ;;  %v791_v30 = vsel %vm569_vm1, %v769_v8, 0 }
 0x1c0   : > { %2334 = vmatpush3.bf16.xpose.msra.mxu1 %v687_v26  ;;  %2339 = vmatprep.mubr.msk.bf16.mxu1 %vm569_vm1, %v3066_v18 }
 0x1c1   : > { %2350 = vmatpush3.bf16.xpose.msra.mxu0 %v788_v61  ;;  %2489 = vmatprep.subr.msk.bf16.mxu1 %vm569_vm1, %v668_v22 }
 0x1c2   : > { %2493 = vmatprep.subr.msk.bf16.mxu0 %vm569_vm1, %v769_v8  ;;  %v771_v32 = vpop.permute.xlu0 %770 }
 0x1c3   : > { %v794_v34 = vsel %vm569_vm1, %v771_v32, 0 }
 0x1c6   : > { %v866_v29 = vpop.permute.xlu1 %865 }
 0x1c7   : > { %v886_v36 = vsel %vm569_vm1, %v866_v29, 0 }
 0x1c8   : > { %2336 = vmatpush3.bf16.xpose.msra.mxu1 %v690_v31 }
 0x1c9   : > { %2352 = vmatpush3.bf16.xpose.msra.mxu0 %v791_v30  ;;  %2490 = vmatprep.subr.msk.bf16.mxu1 %vm569_vm1, %v670_v25 }
 0x1ca   : > { %v868_v7 = vpop.permute.xlu1 %867  ;;  %2494 = vmatprep.subr.msk.bf16.mxu0 %vm569_vm1, %v771_v32 }
 0x1cb   : > { %v889_v40 = vsel %vm569_vm1, %v868_v7, 0 }
 0x1ce   : > { %v872_v18 = vpop.permute.xlu1 %871  ;;  %v870_v38 = vpop.permute.xlu0 %869 }
 0x1cf   : > { %v895_v43 = vsel %vm569_vm1, %v872_v18, 0 }
 0x1d0   : > { %2338 = vmatpush3.bf16.xpose.msra.mxu1 %v693_v33 }
 0x1d1   : > { %2354 = vmatpush3.bf16.xpose.msra.mxu0 %v794_v34  ;;  %2495 = vmatprep.subr.msk.bf16.mxu1 %vm569_vm1, %v866_v29 }
 0x1d2   : > { %v1331_v35 = vpop.permute.xlu1 %1330  ;;  %v1335_v41 = vpop.permute.xlu0 %1334 }
 0x1d3   : > { %2379 = vmatprep.subr.bf16.mxu0 %v1331_v35 }
 0x1d6   : > { %v1333_v39 = vpop.permute.xlu1 %1332 }
 0x1d7   : > { %2340 = vmatmul.mubr.msk.bf16.vlgmr.msra.gmra.mrb[8].mxu1 %vm569_vm1, %v3064_v17 }
 0x1d8   : > { %2356 = vmatmul.mubr.msk.bf16.vlgmr.msra.gmra.mrb[32].mxu0 %vm569_vm1, %v3088_v37  ;;  %2343 = vmatprep.mubr.msk.bf16.mxu1 %vm569_vm1, %v3078_v28  ;;  %v892_v28 = vsel %vm569_vm1, %v870_v38, 0  ;;  %v3203_v37 = vpop.permute.xlu0 %1419 }
 0x1d9   : > { %2359 = vmatprep.mubr.msk.bf16.mxu0 %vm569_vm1, %v3100_v48  ;;  %2364 = vmatpush3.bf16.xpose.msra.mxu1 %v886_v36 }
 0x1da   : > { %2380 = vmatpush3.bf16.msra.mxu0 %v1331_v35  ;;  %2496 = vmatprep.subr.msk.bf16.mxu1 %vm569_vm1, %v868_v7  ;;  %v1337_v17 = vpop.permute.xlu1 %1336 }
 0x1db   : > { %2381 = vmatprep.subr.bf16.mxu0 %v1333_v39 }
 0x1dc   : > { %v3209_v42 = vpop.permute.xlu0 %1421 }
 0x1de   : > { %2382 = vmatpush3.bf16.msra.mxu0 %v1333_v39 }
 0x1df   : > { %2383 = vmatprep.subr.bf16.mxu0 %v1335_v41  ;;  %2344 = vmatmul.mubr.msk.bf16.gmra.mrb[12].mxu1 %vm569_vm1, %v3076_v27  ;;  %v3207_v27 = vpop.permute.xlu1 %1423 }
 0x1e0   : > { %2360 = vmatmul.mubr.msk.bf16.gmra.mrb[36].mxu0 %vm569_vm1, %v3098_v47  ;;  %2371 = vmatprep.mubr.msk.bf16.mxu1 %vm569_vm1, %v3112_v59  ;;  %v3212_v45 = vpop.permute.xlu0 %1425 }
 0x1e1   : > { %2366 = vmatpush3.bf16.xpose.msra.mxu1 %v889_v40 }
 0x1e2   : > { %2384 = vmatpush3.bf16.msra.mxu0 %v1335_v41  ;;  %2497 = vmatprep.subr.msk.bf16.mxu1 %vm569_vm1, %v870_v38 }
 0x1e3   : > { %2385 = vmatprep.subr.bf16.mxu0 %v1337_v17  ;;  %v1509_v44 = vpop.permute.xlu1 %1508 }
 0x1e4   : > { %v1511_v46 = vpop.permute.xlu0 %1510 }
 0x1e6   : > { %2386 = vmatpush3.bf16.msra.mxu0 %v1337_v17 }
 0x1e7   : > { %2395 = vmatprep.subr.bf16.mxu0 %v3203_v37  ;;  %v1513_v48 = vpop.permute.xlu1 %1512 }
 0x1e9   : > { %2368 = vmatpush3.bf16.xpose.msra.mxu1 %v892_v28 }
 0x1ea   : > { %2498 = vmatprep.subr.msk.bf16.mxu1 %vm569_vm1, %v872_v18 }
 0x1f1   : > { %2370 = vmatpush3.bf16.xpose.msra.mxu1 %v895_v43 }
 0x1f2   : > { %2411 = vmatprep.subr.bf16.mxu1 %v1509_v44 }
 0x1f8   : > { %2372 = vmatmul.mubr.msk.bf16.vlgmr.msra.gmra.mrb[16].mxu1 %vm569_vm1, %v3110_v58 }
 0x1f9   : > { %2375 = vmatprep.mubr.msk.bf16.mxu1 %vm569_vm1, %v3124_v9  ;;  %2412 = vmatpush3.bf16.msra.mxu1 %v1509_v44 }
 0x1fa   : > { %2413 = vmatprep.subr.bf16.mxu1 %v1511_v46 }
 0x1fd   : > { %2414 = vmatpush3.bf16.msra.mxu1 %v1511_v46 }
 0x1fe   : > { %2415 = vmatprep.subr.bf16.mxu1 %v1513_v48 }
 0x200   : > { %2376 = vmatmul.mubr.msk.bf16.gmra.mrb[20].mxu1 %vm569_vm1, %v3122_v6 }
 0x201   : > { %2416 = vmatpush3.bf16.msra.mxu1 %v1513_v48 }
 0x28a   : > { %v3220_v49 = vpop.f32.mrb[0].mxu1 }
 0x28b   : > { %v3222_v50 = vpop.f32.mrb[1].mxu1  ;;  %v968_v51 = vsel %vm331_vm0, %v3220_v49, -inf }
 0x28c   : > { %969 = vmax.xlane.f32.xlu0 %v968_v51  ;;  %v3226_v52 = vpop.f32.mrb[2].mxu1  ;;  %v962_v56 = vsel %vm331_vm0, %v3222_v50, -inf }
 0x28d   : > { %v3228_v54 = vpop.f32.mrb[3].mxu1  ;;  %v971_v63 = vsel %vm331_vm0, %v3226_v52, -inf }
 0x28e   : > { %v965_v55 = vsel %vm331_vm0, %v3228_v54, -inf }
 0x28f   : > { %966 = vmax.xlane.f32.xlu1 %v965_v55 }
 0x290   : > { %963 = vmax.xlane.f32.xlu0 %v962_v56 }
 0x292   : > { %v3234_v57 = vpop.f32.mrb[4].mxu1 }
 0x293   : > { %v3236_v60 = vpop.f32.mrb[5].mxu1  ;;  %v980_v0 = vsel %vm331_vm0, %v3234_v57, -inf }
 0x294   : > { %972 = vmax.xlane.f32.xlu0 %v971_v63  ;;  %981 = vmax.xlane.f32.xlu1 %v980_v0  ;;  %v3242_v1 = vpop.f32.mrb[6].mxu1  ;;  %v974_v3 = vsel %vm331_vm0, %v3236_v60, -inf }
 0x295   : > { %v3244_v2 = vpop.f32.mrb[7].mxu1  ;;  %v983_v4 = vsel %vm331_vm0, %v3242_v1, -inf }
 0x296   : > { %v977_v5 = vsel %vm331_vm0, %v3244_v2, -inf }
 0x298   : > { %975 = vmax.xlane.f32.xlu1 %v974_v3  ;;  %984 = vmax.xlane.f32.xlu0 %v983_v4 }
 0x29c   : > { %978 = vmax.xlane.f32.xlu0 %v977_v5 }
 0x2aa   : > { %v3252_v53 = vpop.f32.mrb[8].mxu1 }
 0x2ab   : > { %v3254_v62 = vpop.f32.mrb[32].mxu0  ;;  %v3256_v10 = vpop.f32.mrb[9].mxu1  ;;  %v992_v11 = vsel %vm331_vm0, %v3252_v53, -inf }
 0x2ac   : > { %v3260_v12 = vpop.f32.mrb[33].mxu0  ;;  %993 = vmax.xlane.f32.xlu1 %v992_v11  ;;  %v3262_v13 = vpop.f32.mrb[10].mxu1  ;;  %v1016_v20 = vsel %vm331_vm0, %v3254_v62, -inf  ;;  %v986_v25 = vsel %vm331_vm0, %v3256_v10, -inf }
 0x2ad   : > { %v3264_v14 = vpop.f32.mrb[34].mxu0  ;;  %v3266_v15 = vpop.f32.mrb[11].mxu1  ;;  %v995_v16 = vsel %vm331_vm0, %v3262_v13, -inf  ;;  %v1010_v32 = vsel %vm331_vm0, %v3260_v12, -inf }
 0x2ae   : > { %v3270_v19 = vpop.f32.mrb[35].mxu0  ;;  %996 = vmax.xlane.f32.xlu0 %v995_v16  ;;  %v1019_v21 = vsel %vm331_vm0, %v3264_v14, -inf  ;;  %v989_v30 = vsel %vm331_vm0, %v3266_v15, -inf }
 0x2af   : > { %v1013_v7 = vsel %vm331_vm0, %v3270_v19, -inf }
 0x2b0   : > { %1017 = vmax.xlane.f32.xlu1 %v1016_v20 }
 0x2b2   : > { %1020 = vmax.xlane.f32.xlu0 %v1019_v21  ;;  %v3276_v22 = vpop.f32.mrb[12].mxu1 }
 0x2b3   : > { %v3278_v23 = vpop.f32.mrb[36].mxu0  ;;  %v3280_v24 = vpop.f32.mrb[13].mxu1  ;;  %v1004_v18 = vsel %vm331_vm0, %v3276_v22, -inf }
 0x2b4   : > { %v3284_v26 = vpop.f32.mrb[37].mxu0  ;;  %987 = vmax.xlane.f32.xlu1 %v986_v25  ;;  %v3286_v61 = vpop.f32.mrb[14].mxu1  ;;  %v1028_v34 = vsel %vm331_vm0, %v3278_v23, -inf  ;;  %v998_v36 = vsel %vm331_vm0, %v3280_v24, -inf }
 0x2b5   : > { %v3288_v8 = vpop.f32.mrb[38].mxu0  ;;  %v3290_v29 = vpop.f32.mrb[15].mxu1  ;;  %v1007_v33 = vsel %vm331_vm0, %v3286_v61, -inf  ;;  %v1022_v39 = vsel %vm331_vm0, %v3284_v26, -inf }
 0x2b6   : > { %v3294_v31 = vpop.f32.mrb[39].mxu0  ;;  %990 = vmax.xlane.f32.xlu0 %v989_v30  ;;  %v1031_v35 = vsel %vm331_vm0, %v3288_v8, -inf  ;;  %v1001_v38 = vsel %vm331_vm0, %v3290_v29, -inf }
 0x2b7   : > { %v1025_v40 = vsel %vm331_vm0, %v3294_v31, -inf }
 0x2b8   : > { %1011 = vmax.xlane.f32.xlu1 %v1010_v32 }
 0x2ba   : > { %1014 = vmax.xlane.f32.xlu0 %v1013_v7 }
 0x2bc   : > { %1005 = vmax.xlane.f32.xlu1 %v1004_v18 }
 0x2be   : > { %1008 = vmax.xlane.f32.xlu0 %v1007_v33 }
 0x2c0   : > { %1029 = vmax.xlane.f32.xlu1 %v1028_v34 }
 0x2c2   : > { %1032 = vmax.xlane.f32.xlu0 %v1031_v35 }
 0x2c4   : > { %999 = vmax.xlane.f32.xlu1 %v998_v36 }
 0x2c6   : > { %1002 = vmax.xlane.f32.xlu0 %v1001_v38 }
 0x2c8   : > { %1023 = vmax.xlane.f32.xlu1 %v1022_v39 }
 0x2ca   : > { %1026 = vmax.xlane.f32.xlu0 %v1025_v40 }
 0x2cb   : > { %v3316_v41 = vpop.f32.mrb[16].mxu1 }
 0x2cc   : > { %v3318_v17 = vpop.f32.mrb[17].mxu1  ;;  %v1040_v28 = vsel %vm331_vm0, %v3316_v41, -inf }
 0x2cd   : > { %1041 = vmax.xlane.f32.xlu1 %v1040_v28  ;;  %v3322_v43 = vpop.f32.mrb[18].mxu1  ;;  %v1034_v48 = vsel %vm331_vm0, %v3318_v17, -inf }
 0x2ce   : > { %v3324_v44 = vpop.f32.mrb[19].mxu1  ;;  %v1043_v46 = vsel %vm331_vm0, %v3322_v43, -inf }
 0x2cf   : > { %1044 = vmax.xlane.f32.xlu0 %v1043_v46  ;;  %v1037_v51 = vsel %vm331_vm0, %v3324_v44, -inf }
 0x2d1   : > { %1035 = vmax.xlane.f32.xlu1 %v1034_v48 }
 0x2d3   : > { %1038 = vmax.xlane.f32.xlu0 %v1037_v51  ;;  %v3332_v55 = vpop.f32.mrb[20].mxu1 }
 0x2d4   : > { %v3334_v56 = vpop.f32.mrb[21].mxu1  ;;  %v1052_v63 = vsel %vm331_vm0, %v3332_v55, -inf }
 0x2d5   : > { %1053 = vmax.xlane.f32.xlu1 %v1052_v63  ;;  %v3338_v0 = vpop.f32.mrb[22].mxu1  ;;  %v1046_v5 = vsel %vm331_vm0, %v3334_v56, -inf }
 0x2d6   : > { %v3340_v3 = vpop.f32.mrb[23].mxu1  ;;  %v1055_v4 = vsel %vm331_vm0, %v3338_v0, -inf }
 0x2d7   : > { %1056 = vmax.xlane.f32.xlu0 %v1055_v4  ;;  %v1049_v11 = vsel %vm331_vm0, %v3340_v3, -inf }
 0x2d9   : > { %1047 = vmax.xlane.f32.xlu1 %v1046_v5 }
 0x2db   : > { %1050 = vmax.xlane.f32.xlu0 %v1049_v11 }
 0x2ea   : > { %1597 = vrot.lane.b32.xlu1 %v3112_v59, %s2819_s17 }
 0x2ee   : > { %1599 = vrot.lane.b32.xlu1 %v3110_v58, %s2819_s17 }
 0x2f1   : > { %1514 = vrot.lane.b32.xlu0 %v3098_v47, %s2819_s17 }
 0x319   : > { %v970_v16 = vpop.xlane.xlu0 %969 }
 0x31a   : > { %v1060_v20 = vsub.f32 %v3220_v49, %v970_v16 }
 0x31c   : > { %v1094_v21 = vmul.f32 1.442695, %v1060_v20  ;;  %v967_v25 = vpop.xlane.xlu1 %966 }
 0x31d   : > { %v964_v30 = vpop.xlane.xlu0 %963  ;;  %v1059_v7 = vsub.f32 %v3228_v54, %v967_v25 }
 0x31e   : > { %2557 = vpow2.f32 %v1094_v21  ;;  %v1058_v32 = vsub.f32 %v3222_v50, %v964_v30 }
 0x31f   : > { %v1092_v47 = vmul.f32 1.442695, %v1059_v7 }
 0x320   : > { %v1090_v18 = vmul.f32 1.442695, %v1058_v32 }
 0x321   : > { %v973_v33 = vpop.xlane.xlu0 %972  ;;  %v982_v59 = vpop.xlane.xlu1 %981 }
 0x322   : > { %2559 = vpow2.f32 %v1090_v18  ;;  %v1061_v58 = vsub.f32 %v3226_v52, %v973_v33  ;;  %v1064_v34 = vsub.f32 %v3234_v57, %v982_v59 }
 0x324   : > { %v1096_v35 = vmul.f32 1.442695, %v1061_v58  ;;  %v1102_v36 = vmul.f32 1.442695, %v1064_v34 }
 0x325   : > { %v976_v49 = vpop.xlane.xlu1 %975  ;;  %v985_v38 = vpop.xlane.xlu0 %984 }
 0x326   : > { %2561 = vpow2.f32 %v1096_v35  ;;  %v1062_v39 = vsub.f32 %v3236_v60, %v976_v49  ;;  %v1065_v50 = vsub.f32 %v3242_v1, %v985_v38 }
 0x327   : > { %2563 = vpow2.f32 %v1102_v36 }
 0x328   : > { %v3361_v54 = vpop.eup %2557  ;;  %2565 = vpow2.f32 %v1092_v47  ;;  %v1098_v40 = vmul.f32 1.442695, %v1062_v39  ;;  %v1104_v28 = vmul.f32 1.442695, %v1065_v50 }
 0x329   : > { %v979_v46 = vpop.xlane.xlu0 %978  ;;  %v1160_v52 = vsel %vm331_vm0, %v3361_v54, 0.0 }
 0x32a   : > { %2567 = vpow2.f32 %v1098_v40  ;;  %v1063_v57 = vsub.f32 %v3244_v2, %v979_v46  ;;  %1161 = vadd.xlane.f32.xlu1 %v1160_v52 }
 0x32b   : > { %2569 = vpow2.f32 %v1104_v28 }
 0x32c   : > { %v3366_v48 = vpop.eup %2559  ;;  %v1100_v60 = vmul.f32 1.442695, %v1063_v57 }
 0x32d   : > { %v1154_v1 = vsel %vm331_vm0, %v3366_v48, 0.0 }
 0x32e   : > { %1155 = vadd.xlane.f32.xlu1 %v1154_v1  ;;  %2571 = vpow2.f32 %v1100_v60 }
 0x330   : > { %v3370_v51 = vpop.eup %2561 }
 0x331   : > { %v3372_v63 = vpop.eup %2563  ;;  %v1163_v4 = vsel %vm331_vm0, %v3370_v51, 0.0 }
 0x332   : > { %v3376_v5 = vpop.eup %2565  ;;  %v1172_v2 = vsel %vm331_vm0, %v3372_v63, 0.0  ;;  %1164 = vadd.xlane.f32.xlu0 %v1163_v4 }
 0x333   : > { %1173 = vadd.xlane.f32.xlu1 %v1172_v2  ;;  %v1157_v20 = vsel %vm331_vm0, %v3376_v5, 0.0 }
 0x334   : > { %v3380_v11 = vpop.eup %2567 }
 0x335   : > { %v1166_v16 = vsel %vm331_vm0, %v3380_v11, 0.0  ;;  %v3386_v21 = vpop.eup %2569 }
 0x336   : > { %1158 = vadd.xlane.f32.xlu0 %v1157_v20  ;;  %v1175_v30 = vsel %vm331_vm0, %v3386_v21, 0.0 }
 0x337   : > { %1167 = vadd.xlane.f32.xlu1 %v1166_v16 }
 0x338   : > { %v3390_v32 = vpop.eup %2571 }
 0x339   : > { %v994_v25 = vpop.xlane.xlu1 %993  ;;  %v1169_v58 = vsel %vm331_vm0, %v3390_v32, 0.0 }
 0x33a   : > { %v1068_v7 = vsub.f32 %v3252_v53, %v994_v25  ;;  %1176 = vadd.xlane.f32.xlu0 %v1175_v30 }
 0x33b   : > { %v997_v18 = vpop.xlane.xlu0 %996 }
 0x33c   : > { %v1110_v33 = vmul.f32 1.442695, %v1068_v7  ;;  %v1069_v35 = vsub.f32 %v3262_v13, %v997_v18 }
 0x33d   : > { %v1018_v59 = vpop.xlane.xlu1 %1017 }
 0x33e   : > { %2573 = vpow2.f32 %v1110_v33  ;;  %v1076_v34 = vsub.f32 %v3254_v62, %v1018_v59  ;;  %1170 = vadd.xlane.f32.xlu0 %v1169_v58  ;;  %v1112_v50 = vmul.f32 1.442695, %v1069_v35 }
 0x33f   : > { %v1021_v47 = vpop.xlane.xlu0 %1020 }
 0x340   : > { %v1126_v36 = vmul.f32 1.442695, %v1076_v34  ;;  %v1077_v53 = vsub.f32 %v3264_v14, %v1021_v47 }
 0x341   : > { %v988_v49 = vpop.xlane.xlu1 %987 }
 0x342   : > { %2575 = vpow2.f32 %v1126_v36  ;;  %v1066_v38 = vsub.f32 %v3256_v10, %v988_v49  ;;  %v1128_v52 = vmul.f32 1.442695, %v1077_v53 }
 0x343   : > { %v991_v39 = vpop.xlane.xlu0 %990 }
 0x344   : > { %v1106_v40 = vmul.f32 1.442695, %v1066_v38  ;;  %v1067_v28 = vsub.f32 %v3266_v15, %v991_v39 }
 0x345   : > { %v1012_v46 = vpop.xlane.xlu1 %1011 }
 0x346   : > { %2577 = vpow2.f32 %v1106_v40  ;;  %v1074_v62 = vsub.f32 %v3260_v12, %v1012_v46  ;;  %v1108_v13 = vmul.f32 1.442695, %v1067_v28 }
 0x347   : > { %v1015_v57 = vpop.xlane.xlu0 %1014  ;;  %2579 = vpow2.f32 %v1112_v50 }
 0x348   : > { %v3401_v60 = vpop.eup %2573  ;;  %v1122_v1 = vmul.f32 1.442695, %v1074_v62  ;;  %v1075_v10 = vsub.f32 %v3270_v19, %v1015_v57 }
 0x349   : > { %v1006_v4 = vpop.xlane.xlu1 %1005  ;;  %v1184_v14 = vsel %vm331_vm0, %v3401_v60, 0.0 }
 0x34a   : > { %2581 = vpow2.f32 %v1122_v1  ;;  %v1072_v15 = vsub.f32 %v3276_v22, %v1006_v4  ;;  %1185 = vadd.xlane.f32.xlu0 %v1184_v14  ;;  %v1124_v2 = vmul.f32 1.442695, %v1075_v10 }
 0x34b   : > { %2583 = vpow2.f32 %v1128_v52  ;;  %v1009_v12 = vpop.xlane.xlu0 %1008 }
 0x34c   : > { %v3407_v16 = vpop.eup %2575  ;;  %2585 = vpow2.f32 %v1108_v13  ;;  %v1118_v20 = vmul.f32 1.442695, %v1072_v15  ;;  %v1073_v47 = vsub.f32 %v3286_v61, %v1009_v12 }
 0x34d   : > { %v1030_v25 = vpop.xlane.xlu1 %1029  ;;  %v1208_v30 = vsel %vm331_vm0, %v3407_v16, 0.0  ;;  %2587 = vpow2.f32 %v1124_v2 }
 0x34e   : > { %v1080_v19 = vsub.f32 %v3278_v23, %v1030_v25  ;;  %1209 = vadd.xlane.f32.xlu1 %v1208_v30  ;;  %2589 = vpow2.f32 %v1118_v20  ;;  %v1120_v28 = vmul.f32 1.442695, %v1073_v47 }
 0x34f   : > { %v1033_v7 = vpop.xlane.xlu0 %1032 }
 0x350   : > { %v3412_v18 = vpop.eup %2577  ;;  %v1134_v22 = vmul.f32 1.442695, %v1080_v19 }
 0x351   : > { %v1000_v33 = vpop.xlane.xlu1 %999  ;;  %v1178_v59 = vsel %vm331_vm0, %v3412_v18, 0.0  ;;  %v3416_v58 = vpop.eup %2579 }
 0x352   : > { %v1070_v34 = vsub.f32 %v3280_v24, %v1000_v33  ;;  %1179 = vadd.xlane.f32.xlu0 %v1178_v59  ;;  %2591 = vpow2.f32 %v1134_v22  ;;  %v1187_v50 = vsel %vm331_vm0, %v3416_v58, 0.0 }
 0x353   : > { %v1003_v23 = vpop.xlane.xlu0 %1002 }
 0x354   : > { %v3420_v35 = vpop.eup %2581  ;;  %v1114_v36 = vmul.f32 1.442695, %v1070_v34  ;;  %v1071_v49 = vsub.f32 %v3290_v29, %v1003_v23  ;;  %v1081_v29 = vsub.f32 %v3288_v8, %v1033_v7 }
 0x355   : > { %v3423_v38 = vpop.eup %2583  ;;  %v1024_v53 = vpop.xlane.xlu1 %1023  ;;  %v1202_v39 = vsel %vm331_vm0, %v3420_v35, 0.0 }
 0x356   : > { %v3429_v24 = vpop.eup %2585  ;;  %2593 = vpow2.f32 %v1114_v36  ;;  %v1116_v61 = vmul.f32 1.442695, %v1071_v49  ;;  %v1078_v40 = vsub.f32 %v3284_v26, %v1024_v53  ;;  %1203 = vadd.xlane.f32.xlu1 %v1202_v39  ;;  %1188 = vadd.xlane.f32.xlu0 %v1187_v50  ;;  %v1211_v13 = vsel %vm331_vm0, %v3423_v38, 0.0 }
 0x357   : > { %v1027_v46 = vpop.xlane.xlu0 %1026  ;;  %v3434_v57 = vpop.eup %2587  ;;  %v1181_v1 = vsel %vm331_vm0, %v3429_v24, 0.0  ;;  %v1136_v14 = vmul.f32 1.442695, %v1081_v29 }
 0x358   : > { %2595 = vpow2.f32 %v1116_v61  ;;  %v1130_v62 = vmul.f32 1.442695, %v1078_v40  ;;  %v1079_v52 = vsub.f32 %v3294_v31, %v1027_v46  ;;  %v3440_v10 = vpop.eup %2589  ;;  %v1205_v20 = vsel %vm331_vm0, %v3434_v57, 0.0 }
 0x359   : > { %v1196_v12 = vsel %vm331_vm0, %v3440_v10, 0.0 }
 0x35a   : > { %2597 = vpow2.f32 %v1130_v62  ;;  %v1132_v26 = vmul.f32 1.442695, %v1079_v52  ;;  %v1042_v4 = vpop.xlane.xlu1 %1041  ;;  %1212 = vadd.xlane.f32.xlu1 %v1211_v13  ;;  %1182 = vadd.xlane.f32.xlu0 %v1181_v1 }
 0x35b   : > { %2599 = vpow2.f32 %v1120_v28  ;;  %v1084_v8 = vsub.f32 %v3316_v41, %v1042_v4 }
 0x35c   : > { %2601 = vpow2.f32 %v1132_v26  ;;  %v1045_v31 = vpop.xlane.xlu0 %1044  ;;  %v3443_v15 = vpop.eup %2591 }
 0x35d   : > { %v1142_v2 = vmul.f32 1.442695, %v1084_v8  ;;  %2603 = vpow2.f32 %v1136_v14  ;;  %v1085_v41 = vsub.f32 %v3322_v43, %v1045_v31  ;;  %v1220_v22 = vsel %vm331_vm0, %v3443_v15, 0.0 }
 0x35e   : > { %v1036_v25 = vpop.xlane.xlu1 %1035  ;;  %1197 = vadd.xlane.f32.xlu1 %v1196_v12  ;;  %1206 = vadd.xlane.f32.xlu0 %v1205_v20 }
 0x35f   : > { %v1082_v30 = vsub.f32 %v3318_v17, %v1036_v25  ;;  %2605 = vpow2.f32 %v1142_v2  ;;  %v1144_v49 = vmul.f32 1.442695, %v1085_v41 }
 0x360   : > { %v3450_v19 = vpop.eup %2593  ;;  %v1039_v7 = vpop.xlane.xlu0 %1038 }
 0x361   : > { %v1138_v33 = vmul.f32 1.442695, %v1082_v30  ;;  %v1083_v59 = vsub.f32 %v3324_v44, %v1039_v7  ;;  %v1190_v34 = vsel %vm331_vm0, %v3450_v19, 0.0 }
 0x362   : > { %v3458_v47 = vpop.eup %2595  ;;  %v1054_v23 = vpop.xlane.xlu1 %1053  ;;  %1191 = vadd.xlane.f32.xlu1 %v1190_v34  ;;  %1221 = vadd.xlane.f32.xlu0 %v1220_v22 }
 0x363   : > { %v1140_v17 = vmul.f32 1.442695, %v1083_v59  ;;  %v1088_v36 = vsub.f32 %v3332_v55, %v1054_v23  ;;  %2607 = vpow2.f32 %v1138_v33  ;;  %v1193_v61 = vsel %vm331_vm0, %v3458_v47, 0.0 }
 0x364   : > { %v3461_v43 = vpop.eup %2597  ;;  %v1057_v53 = vpop.xlane.xlu0 %1056 }
 0x365   : > { %v3463_v39 = vpop.eup %2599  ;;  %2609 = vpow2.f32 %v1140_v17  ;;  %v1150_v44 = vmul.f32 1.442695, %v1088_v36  ;;  %v1214_v50 = vsel %vm331_vm0, %v3461_v43, 0.0  ;;  %v1089_v46 = vsub.f32 %v3338_v0, %v1057_v53  ;;  %v3521_v36 = vld [vmem:[%s3800_s3] sm:$0xff]  }
 0x366   : > { %v3469_v40 = vpop.eup %2601  ;;  %v1048_v28 = vpop.xlane.xlu1 %1047  ;;  %1215 = vadd.xlane.f32.xlu1 %v1214_v50  ;;  %1194 = vadd.xlane.f32.xlu0 %v1193_v61  ;;  %2611 = vpow2.f32 %v1144_v49  ;;  %v1199_v62 = vsel %vm331_vm0, %v3463_v39, 0.0 }
 0x367   : > { %v1086_v55 = vsub.f32 %v3334_v56, %v1048_v28  ;;  %2613 = vpow2.f32 %v1150_v44  ;;  %v1217_v1 = vsel %vm331_vm0, %v3469_v40, 0.0  ;;  %v3478_v26 = vpop.eup %2603  ;;  %v1152_v8 = vmul.f32 1.442695, %v1089_v46 }
 0x368   : > { %v1051_v29 = vpop.xlane.xlu0 %1050  ;;  %v1223_v14 = vsel %vm331_vm0, %v3478_v26, 0.0 }
 0x369   : > { %v1146_v52 = vmul.f32 1.442695, %v1086_v55  ;;  %v1087_v13 = vsub.f32 %v3340_v3, %v1051_v29  ;;  %v3480_v4 = vpop.eup %2605 }
 0x36a   : > { %1200 = vadd.xlane.f32.xlu1 %v1199_v62  ;;  %1218 = vadd.xlane.f32.xlu0 %v1217_v1  ;;  %v1232_v3 = vsel %vm331_vm0, %v3480_v4, 0.0  ;;  %v3524_v49 = vpop.permute.xlu1 %1597 }
 0x36b   : > { %v1148_v56 = vmul.f32 1.442695, %v1087_v13  ;;  %2615 = vpow2.f32 %v1146_v52 }
 0x36c   : > { %v1515_v0 = vpop.permute.xlu0 %1514 }
 0x36d   : > { %2617 = vpow2.f32 %v1148_v56  ;;  %2417 = vmatprep.subr.bf16.mxu1 %v1515_v0  ;;  %v3484_v31 = vpop.eup %2607 }
 0x36e   : > { %2418 = vmatpush3.bf16.msra.mxu1 %v1515_v0  ;;  %1224 = vadd.xlane.f32.xlu1 %v1223_v14  ;;  %2619 = vpow2.f32 %v1152_v8  ;;  %v1226_v12 = vsel %vm331_vm0, %v3484_v31, 0.0  ;;  %v3526_v53 = vpop.permute.xlu1 %1599 }
 0x36f   : > { %v3488_v2 = vpop.eup %2609  ;;  %1233 = vadd.xlane.f32.xlu0 %v1232_v3  ;;  %2479 = vmatprep.subr.bf16.mxu1 %v3521_v36 }
 0x370   : > { %v3492_v20 = vpop.eup %2611  ;;  %v1229_v25 = vsel %vm331_vm0, %v3488_v2, 0.0 }
 0x371   : > { %v3496_v30 = vpop.eup %2613  ;;  %v1235_v41 = vsel %vm331_vm0, %v3492_v20, 0.0 }
 0x372   : > { %1227 = vadd.xlane.f32.xlu1 %v1226_v12  ;;  %v1244_v22 = vsel %vm331_vm0, %v3496_v30, 0.0 }
 0x373   : > { %1230 = vadd.xlane.f32.xlu0 %v1229_v25 }
 0x375   : > { %v3500_v7 = vpop.eup %2615 }
 0x376   : > { %1236 = vadd.xlane.f32.xlu1 %v1235_v41  ;;  %v1238_v59 = vsel %vm331_vm0, %v3500_v7, 0.0 }
 0x377   : > { %v3504_v33 = vpop.eup %2617  ;;  %1245 = vadd.xlane.f32.xlu0 %v1244_v22 }
 0x378   : > { %v3508_v34 = vpop.eup %2619  ;;  %v1241_v23 = vsel %vm331_vm0, %v3504_v33, 0.0 }
 0x379   : > { %v1247_v17 = vsel %vm331_vm0, %v3508_v34, 0.0 }
 0x37a   : > { %1239 = vadd.xlane.f32.xlu1 %v1238_v59 }
 0x37b   : > { %1242 = vadd.xlane.f32.xlu0 %v1241_v23 }
 0x37e   : > { %1248 = vadd.xlane.f32.xlu1 %v1247_v17 }
 0x38f   : > { %1603 = vrot.lane.b32.xlu1 %v3122_v6, %s2819_s17 }
 0x391   : > { %1601 = vrot.lane.b32.xlu0 %v3124_v9, %s2819_s17  ;;  %s2820_s17 = smov [#allocation5]  }
 0x392   : > { %s2751_s26 = sshll.u32 %s2820_s17, 4  ;;  %s2752_s26 = int_to_ptr.vmem [resolvable:$false] %s2751_s26 }
 0x393   : > { %s2753_s12 = scalar_lea.vmem %s2752_s26, 8192  ;;  %p2754_p8 = scmp.lt.s32.totalorder %s3746_s7, %s2752_s26 }
 0x394   : > { %p2755_p10 = scmp.lt.s32.totalorder %s2753_s12, %s2747_s13 }
 0x396   : > { %p2756_p0 = por %p2755_p10, %p2754_p8 }
 0x398   : > { %p2757_p2 = pnand %p2756_p0, %p2750_p13 }
 0x3b7   : > { %v1162_v44 = vpop.xlane.xlu1 %1161 }
 0x3bb   : > { %v1156_v50 = vpop.xlane.xlu1 %1155 }
 0x3bf   : > { %v1165_v61 = vpop.xlane.xlu0 %1164 }
 0x3c0   : > { %v1174_v28 = vpop.xlane.xlu1 %1173  ;;  %2621 = vrcp.f32 %v1165_v61 }
 0x3c1   : > { %2623 = vrcp.f32 %v1156_v50 }
 0x3c2   : > { %2625 = vrcp.f32 %v1162_v44 }
 0x3c3   : > { %v1159_v6 = vpop.xlane.xlu0 %1158 }
 0x3c4   : > { %2627 = vrcp.f32 %v1159_v6  ;;  %v1168_v9 = vpop.xlane.xlu1 %1167 }
 0x3c7   : > { %v1177_v55 = vpop.xlane.xlu0 %1176 }
 0x3c8   : > { %2629 = vrcp.f32 %v1177_v55 }
 0x3c9   : > { %2631 = vrcp.f32 %v1168_v9 }
 0x3ca   : > { %v2622_v46 = vpop.eup %2621  ;;  %2633 = vrcp.f32 %v1174_v28 }
 0x3cb   : > { %v1171_v29 = vpop.xlane.xlu0 %1170  ;;  %v2624_v62 = vpop.eup %2623  ;;  %v1285_v1 = vmul.f32 %v2622_v46, %v3370_v51 }
 0x3cc   : > { %2635 = vrcp.f32 %v1171_v29  ;;  %v2626_v52 = vpop.eup %2625  ;;  %v1282_v56 = vmul.f32 %v2624_v62, %v3366_v48 }
 0x3cd   : > { %v1284_v0 = vmul.f32 %v2626_v52, %v3361_v54 }
 0x3ce   : > { %v2628_v13 = vpop.eup %2627 }
 0x3cf   : > { %v1283_v8 = vmul.f32 %v2628_v13, %v3376_v5  ;;  %v1315_v3 = vpack.c.bf16 %v1285_v1, %v1284_v0 }
 0x3d1   : > { %v1314_v14 = vpack.c.bf16 %v1283_v8, %v1282_v56 }
 0x3d2   : > { %v2630_v12 = vpop.eup %2629 }
 0x3d3   : > { %2387 = vmatprep.mubr.msk.bf16.mxu0 %vm331_vm0, %v1314_v14  ;;  %v2632_v25 = vpop.eup %2631  ;;  %v1289_v48 = vmul.f32 %v2630_v12, %v3386_v21 }
 0x3d4   : > { %2388 = vmatmul.mubr.msk.bf16.vlgmr.msra.gmra.mrb[40].mxu0 %vm331_vm0, %v1315_v3  ;;  %v2634_v41 = vpop.eup %2633  ;;  %v1286_v51 = vmul.f32 %v2632_v25, %v3380_v11 }
 0x3d5   : > { %2396 = vmatpush3.bf16.msra.mxu0 %v3203_v37  ;;  %v1288_v5 = vmul.f32 %v2634_v41, %v3372_v63 }
 0x3d6   : > { %v2636_v22 = vpop.eup %2635  ;;  %2397 = vmatprep.subr.bf16.mxu0 %v3209_v42 }
 0x3d7   : > { %v1287_v54 = vmul.f32 %v2636_v22, %v3390_v32  ;;  %v1317_v23 = vpack.c.bf16 %v1289_v48, %v1288_v5  ;;  %v1186_v17 = vpop.xlane.xlu0 %1185 }
 0x3d9   : > { %2398 = vmatpush3.bf16.msra.mxu0 %v3209_v42  ;;  %v1316_v59 = vpack.c.bf16 %v1287_v54, %v1286_v51 }
 0x3da   : > { %2399 = vmatprep.subr.bf16.mxu0 %v3207_v27 }
 0x3db   : > { %2391 = vmatprep.mubr.msk.bf16.mxu0 %vm331_vm0, %v1316_v59  ;;  %v1210_v37 = vpop.xlane.xlu1 %1209 }
 0x3dc   : > { %2392 = vmatmul.mubr.msk.bf16.gmra.mrb[44].mxu0 %vm331_vm0, %v1317_v23 }
 0x3dd   : > { %2400 = vmatpush3.bf16.msra.mxu0 %v3207_v27 }
 0x3de   : > { %2401 = vmatprep.subr.bf16.mxu0 %v3212_v45 }
 0x3df   : > { %v1180_v11 = vpop.xlane.xlu0 %1179 }
 0x3e1   : > { %2402 = vmatpush3.bf16.msra.mxu0 %v3212_v45 }
 0x3e2   : > { %2427 = vmatprep.subr.bf16.mxu0 %v3524_v49 }
 0x3e3   : > { %v1204_v42 = vpop.xlane.xlu1 %1203  ;;  %v1189_v63 = vpop.xlane.xlu0 %1188 }
 0x3e4   : > { %2637 = vrcp.f32 %v1189_v63 }
 0x3e5   : > { %2639 = vrcp.f32 %v1180_v11 }
 0x3e6   : > { %2641 = vrcp.f32 %v1186_v17 }
 0x3e7   : > { %v1213_v21 = vpop.xlane.xlu1 %1212  ;;  %v1183_v32 = vpop.xlane.xlu0 %1182 }
 0x3e8   : > { %2643 = vrcp.f32 %v1183_v32 }
 0x3e9   : > { %2645 = vrcp.f32 %v1213_v21 }
 0x3ea   : > { %2647 = vrcp.f32 %v1204_v42 }
 0x3eb   : > { %v1198_v44 = vpop.xlane.xlu1 %1197  ;;  %v1207_v27 = vpop.xlane.xlu0 %1206  ;;  %2649 = vrcp.f32 %v1210_v37 }
 0x3ec   : > { %2651 = vrcp.f32 %v1207_v27 }
 0x3ee   : > { %v2638_v28 = vpop.eup %2637 }
 0x3ef   : > { %v1192_v50 = vpop.xlane.xlu1 %1191  ;;  %v1222_v61 = vpop.xlane.xlu0 %1221  ;;  %v1293_v55 = vmul.f32 %v2638_v28, %v3416_v58 }
 0x3f0   : > { %v2640_v45 = vpop.eup %2639  ;;  %2653 = vrcp.f32 %v1192_v50 }
 0x3f1   : > { %v2642_v6 = vpop.eup %2641  ;;  %v1290_v52 = vmul.f32 %v2640_v45, %v3412_v18 }
 0x3f2   : > { %v2644_v9 = vpop.eup %2643  ;;  %v1292_v56 = vmul.f32 %v2642_v6, %v3401_v60 }
 0x3f3   : > { %v1216_v46 = vpop.xlane.xlu1 %1215  ;;  %v1195_v29 = vpop.xlane.xlu0 %1194  ;;  %v1291_v13 = vmul.f32 %v2644_v9, %v3429_v24 }
 0x3f4   : > { %v2646_v62 = vpop.eup %2645  ;;  %2655 = vrcp.f32 %v1195_v29  ;;  %v1319_v3 = vpack.c.bf16 %v1293_v55, %v1292_v56 }
 0x3f5   : > { %v2648_v1 = vpop.eup %2647  ;;  %2657 = vrcp.f32 %v1198_v44  ;;  %v1318_v0 = vpack.c.bf16 %v1291_v13, %v1290_v52  ;;  %v1301_v12 = vmul.f32 %v2646_v62, %v3423_v38 }
 0x3f6   : > { %v2650_v8 = vpop.eup %2649  ;;  %2659 = vrcp.f32 %v1216_v46  ;;  %v1298_v18 = vmul.f32 %v2648_v1, %v3420_v35 }
 0x3f7   : > { %v2652_v14 = vpop.eup %2651  ;;  %v1201_v58 = vpop.xlane.xlu1 %1200  ;;  %2403 = vmatprep.mubr.msk.bf16.mxu0 %vm331_vm0, %v1318_v0  ;;  %v1300_v60 = vmul.f32 %v2650_v8, %v3407_v16 }
 0x3f8   : > { %v1219_v25 = vpop.xlane.xlu0 %1218  ;;  %2661 = vrcp.f32 %v1201_v58  ;;  %v1299_v24 = vmul.f32 %v2652_v14, %v3434_v57  ;;  %2404 = vmatmul.mubr.msk.bf16.vlgmr.msra.gmra.mrb[48].mxu0 %vm331_vm0, %v1319_v3 }
 0x3f9   : > { %2663 = vrcp.f32 %v1219_v25  ;;  %2428 = vmatpush3.bf16.msra.mxu0 %v3524_v49  ;;  %v1323_v38 = vpack.c.bf16 %v1301_v12, %v1300_v60 }
 0x3fa   : > { %2665 = vrcp.f32 %v1222_v61  ;;  %v1322_v41 = vpack.c.bf16 %v1299_v24, %v1298_v18  ;;  %2429 = vmatprep.subr.bf16.mxu0 %v3526_v53  ;;  %v2654_v35 = vpop.eup %2653 }
 0x3fb   : > { %v1225_v22 = vpop.xlane.xlu1 %1224  ;;  %v1294_v54 = vmul.f32 %v2654_v35, %v3450_v19 }
 0x3fc   : > { %2667 = vrcp.f32 %v1225_v22  ;;  %2419 = vmatprep.mubr.msk.bf16.mxu1 %vm331_vm0, %v1322_v41  ;;  %v1234_v48 = vpop.xlane.xlu0 %1233 }
 0x3fd   : > { %2420 = vmatmul.mubr.msk.bf16.vlgmr.msra.gmra.mrb[24].mxu1 %vm331_vm0, %v1323_v38  ;;  %2430 = vmatpush3.bf16.msra.mxu0 %v3526_v53 }
 0x3fe   : > { %2481 = vmatpush3.bf16.msra.mxu1 %v3521_v36  ;;  %v2656_v16 = vpop.eup %2655 }
 0x3ff   : > { %v1228_v57 = vpop.xlane.xlu1 %1227  ;;  %v2658_v51 = vpop.eup %2657  ;;  %v1295_v5 = vmul.f32 %v2656_v16, %v3458_v47 }
 0x400   : > { %2669 = vrcp.f32 %v1228_v57  ;;  %v1231_v49 = vpop.xlane.xlu0 %1230  ;;  %v2660_v59 = vpop.eup %2659  ;;  %v1296_v53 = vmul.f32 %v2658_v51, %v3440_v10 }
 0x401   : > { %2671 = vrcp.f32 %v1231_v49  ;;  %v1320_v17 = vpack.c.bf16 %v1295_v5, %v1294_v54  ;;  %v1302_v19 = vmul.f32 %v2660_v59, %v3461_v43 }
 0x402   : > { %v2662_v23 = vpop.eup %2661  ;;  %2673 = vrcp.f32 %v1234_v48 }
 0x403   : > { %v2664_v37 = vpop.eup %2663  ;;  %v1237_v11 = vpop.xlane.xlu1 %1236  ;;  %v1297_v42 = vmul.f32 %v2662_v23, %v3463_v39  ;;  %2407 = vmatprep.mubr.msk.bf16.mxu0 %vm331_vm0, %v1320_v17 }
 0x404   : > { %v2666_v63 = vpop.eup %2665  ;;  %2675 = vrcp.f32 %v1237_v11  ;;  %v1246_v21 = vpop.xlane.xlu0 %1245  ;;  %v1303_v47 = vmul.f32 %v2664_v37, %v3469_v40 }
 0x405   : > { %v1321_v32 = vpack.c.bf16 %v1297_v42, %v1296_v53  ;;  %v1304_v61 = vmul.f32 %v2666_v63, %v3443_v15 }
 0x406   : > { %v2668_v44 = vpop.eup %2667  ;;  %v1324_v27 = vpack.c.bf16 %v1303_v47, %v1302_v19 }
 0x407   : > { %v1240_v50 = vpop.xlane.xlu1 %1239  ;;  %2408 = vmatmul.mubr.msk.bf16.gmra.mrb[52].mxu0 %vm331_vm0, %v1321_v32  ;;  %v1305_v10 = vmul.f32 %v2668_v44, %v3478_v26 }
 0x408   : > { %2677 = vrcp.f32 %v1240_v50  ;;  %2423 = vmatprep.mubr.msk.bf16.mxu1 %vm331_vm0, %v1324_v27  ;;  %v1243_v39 = vpop.xlane.xlu0 %1242 }
 0x409   : > { %2679 = vrcp.f32 %v1243_v39  ;;  %v1325_v28 = vpack.c.bf16 %v1305_v10, %v1304_v61 }
 0x40a   : > { %v2670_v45 = vpop.eup %2669  ;;  %2681 = vrcp.f32 %v1246_v21 }
 0x40b   : > { %v2672_v43 = vpop.eup %2671  ;;  %v1249_v40 = vpop.xlane.xlu1 %1248  ;;  %2424 = vmatmul.mubr.msk.bf16.gmra.mrb[28].mxu1 %vm331_vm0, %v1325_v28  ;;  %v1306_v6 = vmul.f32 %v2670_v45, %v3484_v31 }
 0x40c   : > { %v2674_v9 = vpop.eup %2673  ;;  %2683 = vrcp.f32 %v1249_v40  ;;  %v1602_v55 = vpop.permute.xlu0 %1601  ;;  %v1307_v15 = vmul.f32 %v2672_v43, %v3488_v2 }
 0x40d   : > { %2431 = vmatprep.subr.bf16.mxu0 %v1602_v55  ;;  %v1308_v29 = vmul.f32 %v2674_v9, %v3480_v4 }
 0x40e   : > { %v2676_v26 = vpop.eup %2675  ;;  %2432 = vmatpush3.bf16.msra.mxu0 %v1602_v55  ;;  %v1326_v46 = vpack.c.bf16 %v1307_v15, %v1306_v6 }
 0x40f   : > { %v1309_v62 = vmul.f32 %v2676_v26, %v3492_v20  ;;  %v1604_v52 = vpop.permute.xlu1 %1603 }
 0x410   : > { %2435 = vmatprep.mubr.msk.bf16.mxu0 %vm331_vm0, %v1326_v46  ;;  %2433 = vmatprep.subr.bf16.mxu0 %v1604_v52  ;;  %v3612_v46 = vld [vmem:[%s3801_s4] ss:$0 sm:$0xff] }
 0x411   : > { %v1327_v13 = vpack.c.bf16 %v1309_v62, %v1308_v29 }
 0x412   : > { %v2678_v1 = vpop.eup %2677  ;;  %2434 = vmatpush3.bf16.msra.mxu0 %v1604_v52 }
 0x413   : > { %v2680_v31 = vpop.eup %2679  ;;  %v1310_v56 = vmul.f32 %v2678_v1, %v3500_v7  ;;  %2443 = vmatprep.subr.bf16.mxu0 %v3521_v36  ;;  %v2556_v7 = vld [vmem:[%s3800_s3 + $0x8] sm:$0xff]  }
 0x414   : > { %v2682_v2 = vpop.eup %2681  ;;  %v1311_v8 = vmul.f32 %v2680_v31, %v3504_v33  ;;  %2480 = vmatprep.subr.bf16.mxu1 %v2556_v7  ;;  %v2685_v31 = vld [vmem:[%s2963_s28 + $0x20] sm:$0xff] }
 0x415   : > { %2436 = vmatmul.mubr.msk.bf16.vlgmr.msra.gmra.mrb[56].mxu0 %vm331_vm0, %v1327_v13  ;;  %v1312_v20 = vmul.f32 %v2682_v2, %v3496_v30  ;;  %2482 = vmatpush3.bf16.msra.mxu1 %v2556_v7 }
 0x416   : > { %v2684_v4 = vpop.eup %2683  ;;  %v1328_v0 = vpack.c.bf16 %v1311_v8, %v1310_v56  ;;  %2444 = vmatpush3.bf16.msra.mxu0 %v3521_v36 }
 0x417   : > { %v1313_v14 = vmul.f32 %v2684_v4, %v3508_v34  ;;  %2445 = vmatprep.subr.bf16.mxu0 %v2556_v7  ;;  %v2686_v4 = vld [vmem:[%s2963_s28] sm:$0xff] }
 0x418   : > { %2439 = vmatprep.mubr.msk.bf16.mxu0 %vm331_vm0, %v1328_v0 }
 0x419   : > { %v1329_v3 = vpack.c.bf16 %v1313_v14, %v1312_v20  ;;  %v2687_v14 = vld [vmem:[%s2963_s28 + $0x30] sm:$0xff] }
 0x41a   : > { %2446 = vmatpush3.bf16.msra.mxu0 %v2556_v7  ;;  %v2688_v7 = vld [vmem:[%s2963_s28 + $0x10] sm:$0xff] }
 0x41d   : > { %2440 = vmatmul.mubr.msk.bf16.gmra.mrb[60].mxu0 %vm331_vm0, %v1329_v3 }
 0x4a7   : > { %v2389_v33 = vpop.f32.mrb[40].mxu0 }
 0x4a8   : > { %v1388_v12 = vpop.f32.mrb[41].mxu0 }
 0x4a9   : > { %v2390_v36 = vpop.f32.mrb[42].mxu0 }
 0x4aa   : > { %v1687_v58 = vpack.c.bf16 %v2390_v36, %v2389_v33  ;;  %v1391_v30 = vpop.f32.mrb[43].mxu0 }
 0x4ab   : > { %v1686_v25 = vpack.c.bf16 %v1391_v30, %v1388_v12 }
 0x4ad   : > { %2447 = vmatprep.mubr.msk.bf16.mxu0 %vm569_vm1, %v1686_v25 }
 0x4ae   : > { %2448 = vmatmul.mubr.msk.bf16.vlgmr.msra.gmra.mrb[64].mxu0 %vm569_vm1, %v1687_v58 }
 0x4af   : > { %v2393_v34 = vpop.f32.mrb[44].mxu0 }
 0x4b0   : > { %v1404_v18 = vpop.f32.mrb[45].mxu0 }
 0x4b1   : > { %v2394_v24 = vpop.f32.mrb[46].mxu0 }
 0x4b2   : > { %v1689_v60 = vpack.c.bf16 %v2394_v24, %v2393_v34  ;;  %v1407_v41 = vpop.f32.mrb[47].mxu0  ;;  %v2689_v34 = vld [vmem:[%s2963_s28 + $0x60] sm:$0xff] }
 0x4b3   : > { %v1688_v38 = vpack.c.bf16 %v1407_v41, %v1404_v18  ;;  %v2690_v41 = vld [vmem:[%s2963_s28 + $0x40] sm:$0xff] }
 0x4b5   : > { %2451 = vmatprep.mubr.msk.bf16.mxu0 %vm569_vm1, %v1688_v38 }
 0x4b6   : > { %2452 = vmatmul.mubr.msk.bf16.gmra.mrb[68].mxu0 %vm569_vm1, %v1689_v60 }
 0x4cb   : > { %v2405_v22 = vpop.f32.mrb[48].mxu0 }
 0x4cc   : > { %v1477_v48 = vpop.f32.mrb[49].mxu0 }
 0x4cd   : > { %v2406_v35 = vpop.f32.mrb[50].mxu0 }
 0x4ce   : > { %v1691_v16 = vpack.c.bf16 %v2406_v35, %v2405_v22  ;;  %v1480_v57 = vpop.f32.mrb[51].mxu0 }
 0x4cf   : > { %v1690_v51 = vpack.c.bf16 %v1480_v57, %v1477_v48  ;;  %v2691_v48 = vld [vmem:[%s2963_s28 + $0x70] sm:$0xff] }
 0x4d0   : > { %v2421_v49 = vpop.f32.mrb[24].mxu1 }
 0x4d1   : > { %v1566_v54 = vpop.f32.mrb[25].mxu1  ;;  %2455 = vmatprep.mubr.msk.bf16.mxu0 %vm569_vm1, %v1690_v51 }
 0x4d2   : > { %v2422_v5 = vpop.f32.mrb[26].mxu1  ;;  %2456 = vmatmul.mubr.msk.bf16.gmra.mrb[72].mxu0 %vm569_vm1, %v1691_v16  ;;  %v2692_v16 = vld [vmem:[%s2963_s28 + $0x50] sm:$0xff] }
 0x4d3   : > { %v1695_v59 = vpack.c.bf16 %v2422_v5, %v2421_v49  ;;  %v1569_v23 = vpop.f32.mrb[27].mxu1 }
 0x4d4   : > { %v1694_v17 = vpack.c.bf16 %v1569_v23, %v1566_v54  ;;  %v2693_v23 = vld [vmem:[%s2963_s28 + $0xa0] sm:$0xff] }
 0x4da   : > { %v2409_v37 = vpop.f32.mrb[52].mxu0 }
 0x4db   : > { %v1493_v11 = vpop.f32.mrb[53].mxu0 }
 0x4dc   : > { %v2410_v53 = vpop.f32.mrb[54].mxu0 }
 0x4dd   : > { %v1693_v42 = vpack.c.bf16 %v2410_v53, %v2409_v37  ;;  %v1496_v63 = vpop.f32.mrb[55].mxu0  ;;  %v2694_v53 = vld [vmem:[%s2963_s28 + $0x80] sm:$0xff] }
 0x4de   : > { %v1692_v21 = vpack.c.bf16 %v1496_v63, %v1493_v11  ;;  %v2425_v19 = vpop.f32.mrb[28].mxu1 }
 0x4df   : > { %v1582_v47 = vpop.f32.mrb[29].mxu1 }
 0x4e0   : > { %v2426_v32 = vpop.f32.mrb[30].mxu1  ;;  %2459 = vmatprep.mubr.msk.bf16.mxu1 %vm569_vm1, %v1692_v21  ;;  %v2695_v21 = vld [vmem:[%s2963_s28 + $0xb0] sm:$0xff] }
 0x4e1   : > { %v1697_v44 = vpack.c.bf16 %v2426_v32, %v2425_v19  ;;  %v1585_v27 = vpop.f32.mrb[31].mxu1  ;;  %2460 = vmatmul.mubr.msk.bf16.vlgmr.msra.gmra.mrb[32].mxu1 %vm569_vm1, %v1693_v42 }
 0x4e2   : > { %v1696_v50 = vpack.c.bf16 %v1585_v27, %v1582_v47  ;;  %2463 = vmatprep.mubr.msk.bf16.mxu1 %vm569_vm1, %v1694_v17  ;;  %v2696_v47 = vld [vmem:[%s2963_s28 + $0x90] sm:$0xff] }
 0x4e8   : > { %v2437_v61 = vpop.f32.mrb[56].mxu0 }
 0x4e9   : > { %v1655_v10 = vpop.f32.mrb[57].mxu0  ;;  %2464 = vmatmul.mubr.msk.bf16.gmra.mrb[36].mxu1 %vm569_vm1, %v1695_v59 }
 0x4ea   : > { %v2438_v39 = vpop.f32.mrb[58].mxu0  ;;  %2467 = vmatprep.mubr.msk.bf16.mxu1 %vm569_vm1, %v1696_v50 }
 0x4eb   : > { %v1699_v28 = vpack.c.bf16 %v2438_v39, %v2437_v61  ;;  %v1658_v45 = vpop.f32.mrb[59].mxu0  ;;  %v2697_v39 = vld [vmem:[%s2963_s28 + $0xe0] sm:$0xff] }
 0x4ec   : > { %v1698_v43 = vpack.c.bf16 %v1658_v45, %v1655_v10 }
 0x4f0   : > { %v2441_v40 = vpop.f32.mrb[60].mxu0 }
 0x4f1   : > { %v1671_v6 = vpop.f32.mrb[61].mxu0  ;;  %2468 = vmatmul.mubr.msk.bf16.gmra.mrb[40].mxu1 %vm569_vm1, %v1697_v44 }
 0x4f2   : > { %v2442_v9 = vpop.f32.mrb[62].mxu0  ;;  %2471 = vmatprep.mubr.msk.bf16.mxu1 %vm569_vm1, %v1698_v43 }
 0x4f3   : > { %v1701_v55 = vpack.c.bf16 %v2442_v9, %v2441_v40  ;;  %v1674_v15 = vpop.f32.mrb[63].mxu0  ;;  %v2698_v40 = vld [vmem:[%s2963_s28 + $0xc0] sm:$0xff] }
 0x4f4   : > { %v1700_v26 = vpack.c.bf16 %v1674_v15, %v1671_v6 }
 0x4f9   : > { %2472 = vmatmul.mubr.msk.bf16.gmra.mrb[44].mxu1 %vm569_vm1, %v1699_v28 }
 0x4fa   : > { %2475 = vmatprep.mubr.msk.bf16.mxu1 %vm569_vm1, %v1700_v26  ;;  %v2700_v26 = vld [vmem:[%s2963_s28 + $0xd0] sm:$0xff] }
 0x501   : > { %2476 = vmatmul.mubr.msk.bf16.gmra.mrb[48].mxu1 %vm569_vm1, %v1701_v55  ;;  %v2699_v55 = vld [vmem:[%s2963_s28 + $0xf0] sm:$0xff] }
 0x581   : > { %v2449_v29 = vpop.f32.mrb[64].mxu0 }
 0x582   : > { %v1816_v62 = vadd.f32 %v2449_v29, %v3612_v46  ;;  %v1807_v52 = vpop.f32.mrb[65].mxu0 }
 0x583   : > { %v1808_v13 = vadd.f32 %v3612_v46, %v1807_v52  ;;  %v2450_v1 = vpop.f32.mrb[66].mxu0 }
 0x584   : > { %v1936_v56 = vadd.f32 %v2685_v31, %v1816_v62  ;;  %v1819_v2 = vadd.f32 %v2450_v1, %v3612_v46  ;;  %v1810_v8 = vpop.f32.mrb[67].mxu0 }
 0x585   : > { %v1934_v0 = vadd.f32 %v2686_v4, %v1808_v13  ;;  %v1811_v20 = vadd.f32 %v3612_v46, %v1810_v8 }
 0x586   : > { %1970 = vst.msk [vmem:[%s3622_s29 + $0x20] sm:$0xff] %vm331_vm0, %v1936_v56  ;;  %v1937_v3 = vadd.f32 %v2687_v14, %v1819_v2  ;;  %v2701_v56 = vld [vmem:[%s2963_s28 + $0x28] sm:$0xff] }
 0x587   : > { %1966 = vst.msk [vmem:[%s3622_s29] sm:$0xff] %vm331_vm0, %v1934_v0  ;;  %v1935_v33 = vadd.f32 %v2688_v7, %v1811_v20  ;;  %v2702_v0 = vld [vmem:[%s2963_s28 + $0x8] sm:$0xff] }
 0x588   : > { %1972 = vst.msk [vmem:[%s3622_s29 + $0x30] sm:$0xff] %vm331_vm0, %v1937_v3  ;;  %v2703_v3 = vld [vmem:[%s2963_s28 + $0x38] sm:$0xff] }
 0x589   : > { %1968 = vst.msk [vmem:[%s3622_s29 + $0x10] sm:$0xff] %vm331_vm0, %v1935_v33  ;;  %v2453_v12 = vpop.f32.mrb[68].mxu0  ;;  %v2704_v33 = vld [vmem:[%s2963_s28 + $0x18] sm:$0xff] }
 0x58a   : > { %v1832_v36 = vadd.f32 %v2453_v12, %v3612_v46  ;;  %v1823_v58 = vpop.f32.mrb[69].mxu0 }
 0x58b   : > { %v1824_v30 = vadd.f32 %v3612_v46, %v1823_v58  ;;  %v2454_v25 = vpop.f32.mrb[70].mxu0 }
 0x58c   : > { %v1940_v18 = vadd.f32 %v2689_v34, %v1832_v36  ;;  %v1835_v24 = vadd.f32 %v2454_v25, %v3612_v46  ;;  %v1826_v60 = vpop.f32.mrb[71].mxu0 }
 0x58d   : > { %v1938_v38 = vadd.f32 %v2690_v41, %v1824_v30  ;;  %v1827_v22 = vadd.f32 %v3612_v46, %v1826_v60 }
 0x58e   : > { %1978 = vst.msk [vmem:[%s3622_s29 + $0x60] sm:$0xff] %vm331_vm0, %v1940_v18  ;;  %v1941_v35 = vadd.f32 %v2691_v48, %v1835_v24  ;;  %v2705_v18 = vld [vmem:[%s2963_s28 + $0x68] sm:$0xff] }
 0x58f   : > { %1974 = vst.msk [vmem:[%s3622_s29 + $0x40] sm:$0xff] %vm331_vm0, %v1938_v38  ;;  %v1939_v57 = vadd.f32 %v2692_v16, %v1827_v22  ;;  %v2706_v38 = vld [vmem:[%s2963_s28 + $0x48] sm:$0xff] }
 0x590   : > { %1980 = vst.msk [vmem:[%s3622_s29 + $0x70] sm:$0xff] %vm331_vm0, %v1941_v35  ;;  %v2707_v35 = vld [vmem:[%s2963_s28 + $0x78] sm:$0xff] }
 0x591   : > { %1976 = vst.msk [vmem:[%s3622_s29 + $0x50] sm:$0xff] %vm331_vm0, %v1939_v57  ;;  %v2708_v57 = vld [vmem:[%s2963_s28 + $0x58] sm:$0xff] }
 0x5a5   : > { %v2457_v51 = vpop.f32.mrb[72].mxu0 }
 0x5a6   : > { %v1848_v49 = vadd.f32 %v2457_v51, %v3612_v46  ;;  %v1839_v54 = vpop.f32.mrb[73].mxu0 }
 0x5a7   : > { %v1840_v5 = vadd.f32 %v3612_v46, %v1839_v54  ;;  %v2458_v59 = vpop.f32.mrb[74].mxu0 }
 0x5a8   : > { %v1944_v17 = vadd.f32 %v2693_v23, %v1848_v49  ;;  %v1851_v37 = vadd.f32 %v2458_v59, %v3612_v46  ;;  %v1842_v11 = vpop.f32.mrb[75].mxu0 }
 0x5a9   : > { %v1942_v42 = vadd.f32 %v2694_v53, %v1840_v5  ;;  %v1843_v63 = vadd.f32 %v3612_v46, %v1842_v11 }
 0x5aa   : > { %1986 = vst.msk [vmem:[%s3622_s29 + $0xa0] sm:$0xff] %vm331_vm0, %v1944_v17  ;;  %v1945_v19 = vadd.f32 %v2695_v21, %v1851_v37  ;;  %v2709_v17 = vld [vmem:[%s2963_s28 + $0xa8] sm:$0xff] }
 0x5ab   : > { %1982 = vst.msk [vmem:[%s3622_s29 + $0x80] sm:$0xff] %vm331_vm0, %v1942_v42  ;;  %v1943_v32 = vadd.f32 %v2696_v47, %v1843_v63  ;;  %v2710_v42 = vld [vmem:[%s2963_s28 + $0x88] sm:$0xff] }
 0x5ac   : > { %1988 = vst.msk [vmem:[%s3622_s29 + $0xb0] sm:$0xff] %vm331_vm0, %v1945_v19  ;;  %v2711_v19 = vld [vmem:[%s2963_s28 + $0xb8] sm:$0xff] }
 0x5ad   : > { %1984 = vst.msk [vmem:[%s3622_s29 + $0x90] sm:$0xff] %vm331_vm0, %v1943_v32  ;;  %v2712_v32 = vld [vmem:[%s2963_s28 + $0x98] sm:$0xff] }
 0x5b4   : > { %v2461_v44 = vpop.f32.mrb[32].mxu1 }
 0x5b5   : > { %v1864_v27 = vadd.f32 %v2461_v44, %v3612_v46  ;;  %v1855_v50 = vpop.f32.mrb[33].mxu1 }
 0x5b6   : > { %v1856_v61 = vadd.f32 %v3612_v46, %v1855_v50  ;;  %v2462_v10 = vpop.f32.mrb[34].mxu1 }
 0x5b7   : > { %v1948_v28 = vadd.f32 %v2697_v39, %v1864_v27  ;;  %v1867_v45 = vadd.f32 %v2462_v10, %v3612_v46  ;;  %v1858_v43 = vpop.f32.mrb[35].mxu1 }
 0x5b8   : > { %v1946_v6 = vadd.f32 %v2698_v40, %v1856_v61  ;;  %v1859_v9 = vadd.f32 %v3612_v46, %v1858_v43 }
 0x5b9   : > { %1994 = vst.msk [vmem:[%s3622_s29 + $0xe0] sm:$0xff] %vm331_vm0, %v1948_v28  ;;  %v1949_v15 = vadd.f32 %v2699_v55, %v1867_v45  ;;  %v2713_v28 = vld [vmem:[%s2963_s28 + $0xe8] sm:$0xff] }
 0x5ba   : > { %1990 = vst.msk [vmem:[%s3622_s29 + $0xc0] sm:$0xff] %vm331_vm0, %v1946_v6  ;;  %v1947_v29 = vadd.f32 %v2700_v26, %v1859_v9  ;;  %v2714_v6 = vld [vmem:[%s2963_s28 + $0xc8] sm:$0xff] }
 0x5bb   : > { %1996 = vst.msk [vmem:[%s3622_s29 + $0xf0] sm:$0xff] %vm331_vm0, %v1949_v15  ;;  %v2715_v15 = vld [vmem:[%s2963_s28 + $0xf8] sm:$0xff] }
 0x5bc   : > { %1992 = vst.msk [vmem:[%s3622_s29 + $0xd0] sm:$0xff] %vm331_vm0, %v1947_v29  ;;  %v2465_v62 = vpop.f32.mrb[36].mxu1  ;;  %v2716_v29 = vld [vmem:[%s2963_s28 + $0xd8] sm:$0xff] }
 0x5bd   : > { %v1880_v52 = vadd.f32 %v2465_v62, %v3612_v46  ;;  %v1871_v13 = vpop.f32.mrb[37].mxu1 }
 0x5be   : > { %v1872_v1 = vadd.f32 %v3612_v46, %v1871_v13  ;;  %v2466_v31 = vpop.f32.mrb[38].mxu1 }
 0x5bf   : > { %v1952_v2 = vadd.f32 %v2701_v56, %v1880_v52  ;;  %v1883_v8 = vadd.f32 %v2466_v31, %v3612_v46  ;;  %v1874_v4 = vpop.f32.mrb[39].mxu1 }
 0x5c0   : > { %v1950_v20 = vadd.f32 %v2702_v0, %v1872_v1  ;;  %v1875_v14 = vadd.f32 %v3612_v46, %v1874_v4 }
 0x5c1   : > { %1971 = vst.msk [vmem:[%s3622_s29 + $0x28] sm:$0xff] %vm331_vm0, %v1952_v2  ;;  %v1953_v7 = vadd.f32 %v2703_v3, %v1883_v8 }
 0x5c2   : > { %1967 = vst.msk [vmem:[%s3622_s29 + $0x8] sm:$0xff] %vm331_vm0, %v1950_v20  ;;  %v1951_v12 = vadd.f32 %v2704_v33, %v1875_v14 }
 0x5c3   : > { %1973 = vst.msk [vmem:[%s3622_s29 + $0x38] sm:$0xff] %vm331_vm0, %v1953_v7 }
 0x5c4   : > { %1969 = vst.msk [vmem:[%s3622_s29 + $0x18] sm:$0xff] %vm331_vm0, %v1951_v12  ;;  %v2469_v36 = vpop.f32.mrb[40].mxu1 }
 0x5c5   : > { %v1896_v58 = vadd.f32 %v2469_v36, %v3612_v46  ;;  %v1887_v30 = vpop.f32.mrb[41].mxu1 }
 0x5c6   : > { %v1888_v25 = vadd.f32 %v3612_v46, %v1887_v30  ;;  %v2470_v34 = vpop.f32.mrb[42].mxu1 }
 0x5c7   : > { %v1956_v24 = vadd.f32 %v2705_v18, %v1896_v58  ;;  %v1899_v60 = vadd.f32 %v2470_v34, %v3612_v46  ;;  %v1890_v41 = vpop.f32.mrb[43].mxu1 }
 0x5c8   : > { %v1954_v22 = vadd.f32 %v2706_v38, %v1888_v25  ;;  %v1891_v48 = vadd.f32 %v3612_v46, %v1890_v41 }
 0x5c9   : > { %1979 = vst.msk [vmem:[%s3622_s29 + $0x68] sm:$0xff] %vm331_vm0, %v1956_v24  ;;  %v1957_v16 = vadd.f32 %v2707_v35, %v1899_v60 }
 0x5ca   : > { %1975 = vst.msk [vmem:[%s3622_s29 + $0x48] sm:$0xff] %vm331_vm0, %v1954_v22  ;;  %v1955_v51 = vadd.f32 %v2708_v57, %v1891_v48 }
 0x5cb   : > { %1981 = vst.msk [vmem:[%s3622_s29 + $0x78] sm:$0xff] %vm331_vm0, %v1957_v16 }
 0x5cc   : > { %1977 = vst.msk [vmem:[%s3622_s29 + $0x58] sm:$0xff] %vm331_vm0, %v1955_v51  ;;  %v2473_v49 = vpop.f32.mrb[44].mxu1 }
 0x5cd   : > { %v1912_v54 = vadd.f32 %v2473_v49, %v3612_v46  ;;  %v1903_v5 = vpop.f32.mrb[45].mxu1 }
 0x5ce   : > { %v1904_v59 = vadd.f32 %v3612_v46, %v1903_v5  ;;  %v2474_v23 = vpop.f32.mrb[46].mxu1 }
 0x5cf   : > { %v1960_v37 = vadd.f32 %v2709_v17, %v1912_v54  ;;  %v1915_v11 = vadd.f32 %v2474_v23, %v3612_v46  ;;  %v1906_v53 = vpop.f32.mrb[47].mxu1 }
 0x5d0   : > { %v1958_v63 = vadd.f32 %v2710_v42, %v1904_v59  ;;  %v1907_v21 = vadd.f32 %v3612_v46, %v1906_v53 }
 0x5d1   : > { %1987 = vst.msk [vmem:[%s3622_s29 + $0xa8] sm:$0xff] %vm331_vm0, %v1960_v37  ;;  %v1961_v47 = vadd.f32 %v2711_v19, %v1915_v11 }
 0x5d2   : > { %1983 = vst.msk [vmem:[%s3622_s29 + $0x88] sm:$0xff] %vm331_vm0, %v1958_v63  ;;  %v1959_v44 = vadd.f32 %v2712_v32, %v1907_v21 }
 0x5d3   : > { %1989 = vst.msk [vmem:[%s3622_s29 + $0xb8] sm:$0xff] %vm331_vm0, %v1961_v47 }
 0x5d4   : > { %1985 = vst.msk [vmem:[%s3622_s29 + $0x98] sm:$0xff] %vm331_vm0, %v1959_v44  ;;  %v2477_v27 = vpop.f32.mrb[48].mxu1 }
 0x5d5   : > { %v1928_v50 = vadd.f32 %v2477_v27, %v3612_v46  ;;  %v1919_v61 = vpop.f32.mrb[49].mxu1 }
 0x5d6   : > { %v1920_v10 = vadd.f32 %v3612_v46, %v1919_v61  ;;  %v2478_v39 = vpop.f32.mrb[50].mxu1 }
 0x5d7   : > { %v1964_v45 = vadd.f32 %v2713_v28, %v1928_v50  ;;  %v1931_v43 = vadd.f32 %v2478_v39, %v3612_v46  ;;  %v1922_v40 = vpop.f32.mrb[51].mxu1 }
 0x5d8   : > { %v1962_v9 = vadd.f32 %v2714_v6, %v1920_v10  ;;  %v1923_v55 = vadd.f32 %v3612_v46, %v1922_v40 }
 0x5d9   : > { %1995 = vst.msk [vmem:[%s3622_s29 + $0xe8] sm:$0xff] %vm331_vm0, %v1964_v45  ;;  %v1965_v26 = vadd.f32 %v2715_v15, %v1931_v43 }
 0x5da   : > { %1991 = vst.msk [vmem:[%s3622_s29 + $0xc8] sm:$0xff] %vm331_vm0, %v1962_v9  ;;  %v1963_v62 = vadd.f32 %v2716_v29, %v1923_v55 }
 0x5db   : > { %1997 = vst.msk [vmem:[%s3622_s29 + $0xf8] sm:$0xff] %vm331_vm0, %v1965_v26 }
 0x5dc   : > { %1993 = vst.msk [vmem:[%s3622_s29 + $0xd8] sm:$0xff] %vm331_vm0, %v1963_v62 }
 0x5dd   : > { %2760 = shalt.err (!%p2757_p2)
}
 0x5de   : > { %s2761_s28 = scalar_lea.hbm %s3744_s10, 4096  ;;  %s2765_s16 = scalar_lea.hbm %s3802_s5, 8192 }
 0x5df   : > { %p2762_p4 = scmp.ne.s32.totalorder %s3744_s10, %s2761_s28  ;;  %p2766_p9 = scmp.lt.u32.totalorder %s3744_s10, %s3802_s5 }
 0x5e0   : > { %p2767_p1 = scmp.lt.u32.totalorder %s2765_s16, %s2761_s28  ;;  %p2769_p6 = scmp.lt.u32.totalorder %s2761_s28, %s3744_s10 }
 0x5e1   : > { %p2763_p5 = pnand %p2762_p4, %p3809_p11 }
 0x5e2   : > { %p2768_p3 = por %p2767_p1, %p2766_p9 }
 0x5e3   : > { %p2764_p7 = pneg %p2763_p5 }
 0x5e4   : > { %p2770_p12 = por %p2769_p6, %p2768_p3 }
 0x5e6   : > { %p2771_p13 = pnand %p2770_p12, %p2764_p7 }
 0x5e8   : > { %2774 = shalt.err (!%p2771_p13)
}
 0x5e9   : > { %s2821_s25 = smov 128   ;;  %s2822_s9 = smov 8  }
 0x5ea   : > { %2501 = dma.vmem_to_hbm [thread:$0]  (%p3809_p11), %s3746_s7, 4096, %s3744_s10, %s1999_s11, %s2821_s25, %s2821_s25, %s2822_s9  }
 0x5eb PF: > { %s2027_s22 = sand.u32 1, %s2801_s18   ;;  %p3810_p8 = scmp.ne.s32.totalorder %s3807_s6, 0 }
 0x5ec   : > { %p3811_p10 = scmp.ge.s32.totalorder %s2813_s21, 2  ;;  %s2028_s13 = scalar_lea.sflag [#allocation4], %s2027_s22 }
 0x5ee   : > { %p2508_p0 = pnand %p3811_p10, %p3810_p8 }
 0x5f0   : > { %2796 = dma.done.wait (!%p2508_p0), %s2028_s13, 4096  }
 0x5f1   : > { %2798 = vsyncadd (!%p2508_p0), %s2028_s13, 4294963200  ;;  %p18_p2 = scmp.ge.s32.totalorder %s2878_s24, 4   ;;  %s3812_s18 = smov %s2805_s19 }
 0x5f2   : > { %s3813_s19 = smov %s2809_s20  ;;  %s3814_s20 = smov %s2890_s27 }
 0x5f3   : > { %s3815_s21 = smov %s2878_s24  ;;  %20 = sbr.rel (!%p18_p2) target bundleno = 5 (0x5), region = 85 }
 0x5fa   :  { %2033 = vsyncpa [#allocation3], 1 }
 0x5fb   :  { %2035 = vsyncpa [#allocation3 + $0x1], 1 }
 0x5fc   :  { %2036 = vsyncpa [#allocation4], 1 }
 0x5fd   :  { %2038 = vsyncpa [#allocation4 + $0x1], 1 }

</bundles_post_ra>
